<compile_context>
chip_gen: v7x
topology: tpu7x:2x2x1
jax: 0.10.0
libtpu: 0.0.40
codegen_flags: <defaults>
</compile_context>

<pallas_src>
import numpy as np
import jax
import jax.numpy as jnp
from jax import lax
from jax.experimental import pallas as pl
from jax.experimental.pallas import tpu as pltpu


# ---------------------------------------------------------------------------
# Static tap structure of ConvTranspose2d(kernel=4, stride=2, padding=1).
# Output row 2m + a receives input rows m + dh with kernel row kh:
#   a = 0 : (dh = 0, kh = 1), (dh = -1, kh = 3)
#   a = 1 : (dh = +1, kh = 0), (dh = 0, kh = 2)
# (identical structure along width with b / dw / kw).
# ---------------------------------------------------------------------------
_TA = {0: ((0, 1), (-1, 3)), 1: ((1, 0), (0, 2))}
_PARITIES = ((0, 0), (0, 1), (1, 0), (1, 1))              # j = 2*a + b
_SHIFTS9 = tuple((dh, dw) for dh in (-1, 0, 1) for dw in (-1, 0, 1))
_KOF = {(a, dh): kh for a in (0, 1) for (dh, kh) in _TA[a]}

_LANE_ALIGN = 128   # data offset inside the flat shift scratch (aligned store)


# ---------------------------------------------------------------------------
# Wrapper-side packing (plain JAX/XLA + numpy constants, outside the kernel).
# ---------------------------------------------------------------------------
def _pack_w(w):
    """(Cin, Cout, 4, 4) torch ConvT weight -> (4*Cout, 9*Cin) with parity
    row-blocks and shift-major K columns (zeros for unused (parity, shift))."""
    cin, cout = w.shape[0], w.shape[1]
    rows = []
    for (a, b) in _PARITIES:
        blocks = []
        for (dh, dw) in _SHIFTS9:
            kh = _KOF.get((a, dh))
            kw = _KOF.get((b, dw))
            if kh is None or kw is None:
                blocks.append(jnp.zeros((cout, cin), w.dtype))
            else:
                blocks.append(w[:, :, kh, kw].T)            # (Cout, Cin)
        rows.append(jnp.concatenate(blocks, axis=1))        # (Cout, 9*Cin)
    return jnp.concatenate(rows, axis=0)                    # (4*Cout, 9*Cin)


def _pack_b(b):
    """(Cout,) -> (4*Cout, 1) column replicated over the 4 parity row-blocks."""
    return jnp.tile(b, 4).reshape(4 * b.shape[0], 1)


def _im2col_T(x):
    """NCHW (N, C, H, W) -> (N, 9*C, H*W): the 9 zero-padded (dh, dw)-shifted
    views stacked shift-major along rows, spatial flattened onto lanes."""
    n, c, h, w = x.shape
    xp = jnp.pad(x, ((0, 0), (0, 0), (1, 1), (1, 1)))
    slabs = [xp[:, :, 1 + dh:1 + dh + h, 1 + dw:1 + dw + w]
             for (dh, dw) in _SHIFTS9]
    return jnp.concatenate(slabs, axis=1).reshape(n, 9 * c, h * w)


def _perm_interleave(hc, wc):
    """(4, Mc, 4*Mc) exact 0/1 matrices mapping parity plane j (coarse
    row-major columns) onto its lanes in the row-major fine (2hc, 2wc) grid."""
    mc, wf = hc * wc, 2 * wc
    p = np.zeros((4, mc, 4 * mc), np.float32)
    for a in (0, 1):
        for b in (0, 1):
            j = 2 * a + b
            for mh in range(hc):
                for mw in range(wc):
                    p[j, mh * wc + mw, (2 * mh + a) * wf + (2 * mw + b)] = 1.0
    return p


# ---------------------------------------------------------------------------
# Fused decoder kernel.
# ---------------------------------------------------------------------------
def _decoder_pallas(x_nchw, params):
    (w3, b3), (w2, b2), (w1, b1) = params
    N, C3, H0, W0 = x_nchw.shape
    C2, C1, CO = w3.shape[1], w2.shape[1], w1.shape[1]
    H1, W1 = 2 * H0, 2 * W0              # layer-2 input spatial size
    H2, W2 = 2 * H1, 2 * W1              # layer-1 input spatial size
    M0, M1, M2 = H0 * W0, H1 * W1, H2 * W2
    A = _LANE_ALIGN

    slab0 = _im2col_T(x_nchw)                                # (N, 9*C3, M0)
    w3p, w2p, w1p = _pack_w(w3), _pack_w(w2), _pack_w(w1)    # (4*Cout, 9*Cin)
    b3c, b2c, b1c = _pack_b(b3), _pack_b(b2), _pack_b(b1)    # (4*Cout, 1)
    # Exact 0/1 permutation matrices (bf16 halves their HBM->VMEM DMA; values
    # are exactly representable, dot is done in f32 after an in-kernel cast).
    p32 = jnp.asarray(_perm_interleave(H0, W0), jnp.bfloat16)   # (4, M0, M1)
    p21 = jnp.asarray(_perm_interleave(H1, W1), jnp.bfloat16)   # (4, M1, M2)

    def kernel(slab_ref, w3_ref, b3_ref, p32_ref, w2_ref, b2_ref, p21_ref,
               w1_ref, b1_ref, out_ref, pad1, ksl1, pad2, ksl2):
        f32 = jnp.float32

        def interleave(acc, cout, perm_ref):
            # fine image (cout, Mfine) = sum_j parity-row-block_j @ Perm_j
            # (4 small dots on the idle MXU; no lane shuffles / relayouts).
            y = jnp.dot(acc[0:cout, :], perm_ref[0].astype(f32),
                        preferred_element_type=f32)
            for j in range(1, 4):
                y = y + jnp.dot(acc[j * cout:(j + 1) * cout, :],
                                perm_ref[j].astype(f32),
                                preferred_element_type=f32)
            return y

        def build_kslab(y, pad_ref, ksl_ref, cin, wid):
            # K-stacked (9*cin, m) shifted copies of y (cin, m) via a flat,
            # lane-padded scratch: aligned store + 9 static-offset loads +
            # iota masks at the row-wrap boundaries (dh handled by zero pad).
            m = y.shape[1]
            pad_ref[...] = jnp.zeros_like(pad_ref)
            pad_ref[:, A:A + m] = y
            col = lax.broadcasted_iota(jnp.int32, (1, m), 1) % wid
            for s, (dh, dw) in enumerate(_SHIFTS9):
                off = A + dh * wid + dw
                xs = pad_ref[:, off:off + m]
                if dw == 1:
                    xs = jnp.where(col != wid - 1, xs, 0.0)
                elif dw == -1:
                    xs = jnp.where(col != 0, xs, 0.0)
                ksl_ref[s * cin:(s + 1) * cin, :] = xs

        # ---- layer 3: one K = 9*C3 dot over the wrapper-built im2col slab ---
        acc3 = jnp.dot(w3_ref[...], slab_ref[0],
                       preferred_element_type=f32) + b3_ref[...]   # (4*C2, M0)

        # ---- layer 2 --------------------------------------------------------
        y1 = interleave(acc3, C2, p32_ref)                         # (C2, M1)
        build_kslab(y1, pad1, ksl1, C2, W1)
        acc2 = jnp.dot(w2_ref[...], ksl1[...],
                       preferred_element_type=f32) + b2_ref[...]   # (4*C1, M1)

        # ---- layer 1 --------------------------------------------------------
        y2 = interleave(acc2, C1, p21_ref)                         # (C1, M2)
        build_kslab(y2, pad2, ksl2, C1, W2)
        acc1 = jnp.dot(w1_ref[...], ksl2[...],
                       preferred_element_type=f32) + b1_ref[...]   # (4*CO, M2)

        # single lane-dense HBM store per image (last dim M2 = 256).
        out_ref[0] = acc1.astype(out_ref.dtype)

    flops = 2 * N * ((4 * C2) * (9 * C3) * M0 + 4 * C2 * M0 * M1
                     + (4 * C1) * (9 * C2) * M1 + 4 * C1 * M1 * M2
                     + (4 * CO) * (9 * C1) * M2)
    bytes_accessed = (4 * (slab0.size + N * 4 * CO * M2
                           + w3p.size + w2p.size + w1p.size
                           + b3c.size + b2c.size + b1c.size)
                      + 2 * (p32.size + p21.size))

    out = pl.pallas_call(
        kernel,
        out_shape=jax.ShapeDtypeStruct((N, 4 * CO, M2), x_nchw.dtype),
        grid_spec=pltpu.PrefetchScalarGridSpec(
            num_scalar_prefetch=0,
            grid=(N,),
            in_specs=[
                pl.BlockSpec((1, 9 * C3, M0), lambda n: (n, 0, 0)),
                pl.BlockSpec((4 * C2, 9 * C3), lambda n: (0, 0)),
                pl.BlockSpec((4 * C2, 1), lambda n: (0, 0)),
                pl.BlockSpec((4, M0, M1), lambda n: (0, 0, 0)),
                pl.BlockSpec((4 * C1, 9 * C2), lambda n: (0, 0)),
                pl.BlockSpec((4 * C1, 1), lambda n: (0, 0)),
                pl.BlockSpec((4, M1, M2), lambda n: (0, 0, 0)),
                pl.BlockSpec((4 * CO, 9 * C1), lambda n: (0, 0)),
                pl.BlockSpec((4 * CO, 1), lambda n: (0, 0)),
            ],
            out_specs=pl.BlockSpec((1, 4 * CO, M2), lambda n: (n, 0, 0)),
            scratch_shapes=[
                pltpu.VMEM((C2, A + M1 + A), jnp.float32),   # layer-2 shift pad
                pltpu.VMEM((9 * C2, M1), jnp.float32),       # layer-2 K-slab
                pltpu.VMEM((C1, A + M2 + A), jnp.float32),   # layer-1 shift pad
                pltpu.VMEM((9 * C1, M2), jnp.float32),       # layer-1 K-slab
            ]),
        compiler_params=pltpu.CompilerParams(
            dimension_semantics=("parallel",),
            vmem_limit_bytes=32 * 1024 * 1024),
        cost_estimate=pl.CostEstimate(
            flops=flops, transcendentals=0, bytes_accessed=bytes_accessed),
    )(slab0, w3p, b3c, p32, w2p, b2c, p21, w1p, b1c)

    # Final parity -> spatial interleave (wrapper-side layout plumbing only).
    y = out.reshape(N, 2, 2, CO, H2, W2)
    y = jnp.transpose(y, (0, 3, 4, 1, 5, 2)).reshape(N, CO, 2 * H2, 2 * W2)
    return y


def decoder_forward(states, params):
    """states: (N, 1, C3, H, W) -> (N, out_channel, 8H, 8W), NCHW like PyTorch."""
    x = jnp.squeeze(states, axis=1)              # (N, C3, H, W)
    return _decoder_pallas(x, params)


# ----------------------- pure-JAX reference (for checking) ------------------
def _convt_ref_nchw(x, w, b):
    # conv_transpose(k=4,s=2,p=1) == conv(lhs_dilation=2, pad=k-1-p=2, flipped W)
    wc = jnp.transpose(w, (1, 0, 2, 3))[:, :, ::-1, ::-1]   # (Cout, Cin, 4, 4)
    y = jax.lax.conv_general_dilated(
        x, wc, window_strides=(1, 1), padding=((2, 2), (2, 2)),
        lhs_dilation=(2, 2), dimension_numbers=("NCHW", "OIHW", "NCHW"))
    return y + b[None, :, None, None]


def _decoder_ref(states, params):
    x = jnp.squeeze(states, axis=1)
    for (w, b) in params:
        x = _convt_ref_nchw(x, w, b)
    return x


def _init_convt(key, cin, cout, k=4):
    wk, bk = jax.random.split(key)
    bound = 1.0 / np.sqrt(cin * k * k)
    w = jax.random.uniform(wk, (cin, cout, k, k), jnp.float32, -bound, bound)
    b = jax.random.uniform(bk, (cout,), jnp.float32, -bound, bound)
    return w, b


if __name__ == "__main__":
    # Small deterministic config: hidden3=32, hidden2=16, hidden1=8, out=3.
    hidden_channel1, hidden_channel2, hidden_channel3, out_channel = 8, 16, 32, 3
    N, H, W = 2, 4, 4

    key = jax.random.PRNGKey(0)
    k3, k2, k1, kx = jax.random.split(key, 4)
    params = [
        _init_convt(k3, hidden_channel3, hidden_channel2),   # conv_layer3
        _init_convt(k2, hidden_channel2, hidden_channel1),   # conv_layer2
        _init_convt(k1, hidden_channel1, out_channel),       # conv_layer1
    ]

    states = jax.random.normal(kx, (N, 1, hidden_channel3, H, W), jnp.float32)

    fwd = jax.jit(decoder_forward)
    out = jax.block_until_ready(fwd(states, params))
    assert out.shape == (N, out_channel, 8 * H, 8 * W), out.shape

    ref = jax.block_until_ready(_decoder_ref(states, params))
    assert jnp.allclose(out, ref, atol=1e-4, rtol=1e-4), float(
        jnp.max(jnp.abs(out - ref)))

    print("KERNEL_OK")
</pallas_src>

<mosaic_0001>
module attributes {stable_mosaic.version = 11 : i64} {
  func.func @kernel(%arg0: i32, %arg1: memref<1x288x16xf32, #tpu.memory_space<vmem>>, %arg2: memref<64x288xf32, #tpu.memory_space<vmem>>, %arg3: memref<64x1xf32, #tpu.memory_space<vmem>>, %arg4: memref<4x16x64xbf16, #tpu.memory_space<vmem>>, %arg5: memref<32x144xf32, #tpu.memory_space<vmem>>, %arg6: memref<32x1xf32, #tpu.memory_space<vmem>>, %arg7: memref<4x64x256xbf16, #tpu.memory_space<vmem>>, %arg8: memref<12x72xf32, #tpu.memory_space<vmem>>, %arg9: memref<12x1xf32, #tpu.memory_space<vmem>>, %arg10: memref<1x12x256xf32, #tpu.memory_space<vmem>>, %arg11: memref<16x320xf32, #tpu.memory_space<vmem>>, %arg12: memref<144x64xf32, #tpu.memory_space<vmem>>, %arg13: memref<8x512xf32, #tpu.memory_space<vmem>>, %arg14: memref<72x256xf32, #tpu.memory_space<vmem>>) attributes {dimension_semantics = [#tpu.dimension_semantics<parallel>], iteration_bounds = array<i64: 2>, scalar_prefetch = 0 : i64, scratch_operands = 4 : i64, tpu.core_type = #tpu.core_type<tc>, window_params = [{transform_indices = @transform_0, window_bounds = array<i64: 1, 288, 16>}, {pipeline_mode = #tpu.pipeline_mode<synchronous>, transform_indices = @transform_1, window_bounds = array<i64: 64, 288>}, {pipeline_mode = #tpu.pipeline_mode<synchronous>, transform_indices = @transform_2, window_bounds = array<i64: 64, 1>}, {pipeline_mode = #tpu.pipeline_mode<synchronous>, transform_indices = @transform_3, window_bounds = array<i64: 4, 16, 64>}, {pipeline_mode = #tpu.pipeline_mode<synchronous>, transform_indices = @transform_4, window_bounds = array<i64: 32, 144>}, {pipeline_mode = #tpu.pipeline_mode<synchronous>, transform_indices = @transform_5, window_bounds = array<i64: 32, 1>}, {pipeline_mode = #tpu.pipeline_mode<synchronous>, transform_indices = @transform_6, window_bounds = array<i64: 4, 64, 256>}, {pipeline_mode = #tpu.pipeline_mode<synchronous>, transform_indices = @transform_7, window_bounds = array<i64: 12, 72>}, {pipeline_mode = #tpu.pipeline_mode<synchronous>, transform_indices = @transform_8, window_bounds = array<i64: 12, 1>}, {transform_indices = @transform_9, window_bounds = array<i64: 1, 12, 256>}]} {
    %c0 = arith.constant 0 : index
    %c0_0 = arith.constant 0 : index
    %0 = vector.load %arg2[%c0, %c0_0] : memref<64x288xf32, #tpu.memory_space<vmem>>, vector<64x288xf32>
    %c0_1 = arith.constant 0 : index
    %c0_2 = arith.constant 0 : index
    %c0_3 = arith.constant 0 : index
    %1 = vector.load %arg1[%c0_1, %c0_2, %c0_3] : memref<1x288x16xf32, #tpu.memory_space<vmem>>, vector<1x288x16xf32>
    %2 = vector.shape_cast %1 : vector<1x288x16xf32> to vector<288x16xf32>
    %cst = arith.constant dense<0.000000e+00> : vector<64x16xf32>
    %3 = tpu.matmul %0, %2, %cst {dimension_numbers = #tpu.dot_dimension_numbers<[1], [0], [0], [1], [0, 0, 1, 1], [], []>} : vector<64x288xf32>, vector<288x16xf32>, vector<64x16xf32> -> vector<64x16xf32>
    %c0_4 = arith.constant 0 : index
    %c0_5 = arith.constant 0 : index
    %4 = vector.load %arg3[%c0_4, %c0_5] : memref<64x1xf32, #tpu.memory_space<vmem>>, vector<64x1xf32>
    %5 = vector.broadcast %4 : vector<64x1xf32> to vector<64x16xf32>
    %6 = arith.addf %3, %5 : vector<64x16xf32>
    %7 = vector.extract_strided_slice %6 {offsets = [0, 0], sizes = [16, 16], strides = [1, 1]} : vector<64x16xf32> to vector<16x16xf32>
    %c0_6 = arith.constant 0 : index
    %c0_7 = arith.constant 0 : index
    %c0_8 = arith.constant 0 : index
    %8 = vector.load %arg4[%c0_6, %c0_7, %c0_8] : memref<4x16x64xbf16, #tpu.memory_space<vmem>>, vector<1x16x64xbf16>
    %9 = vector.shape_cast %8 : vector<1x16x64xbf16> to vector<16x64xbf16>
    %10 = arith.extf %9 : vector<16x64xbf16> to vector<16x64xf32>
    %cst_9 = arith.constant dense<0.000000e+00> : vector<16x64xf32>
    %11 = tpu.matmul %7, %10, %cst_9 {dimension_numbers = #tpu.dot_dimension_numbers<[1], [0], [0], [1], [0, 0, 1, 1], [], []>} : vector<16x16xf32>, vector<16x64xf32>, vector<16x64xf32> -> vector<16x64xf32>
    %12 = vector.extract_strided_slice %6 {offsets = [16, 0], sizes = [16, 16], strides = [1, 1]} : vector<64x16xf32> to vector<16x16xf32>
    %c1 = arith.constant 1 : index
    %c0_10 = arith.constant 0 : index
    %c0_11 = arith.constant 0 : index
    %13 = vector.load %arg4[%c1, %c0_10, %c0_11] : memref<4x16x64xbf16, #tpu.memory_space<vmem>>, vector<1x16x64xbf16>
    %14 = vector.shape_cast %13 : vector<1x16x64xbf16> to vector<16x64xbf16>
    %15 = arith.extf %14 : vector<16x64xbf16> to vector<16x64xf32>
    %cst_12 = arith.constant dense<0.000000e+00> : vector<16x64xf32>
    %16 = tpu.matmul %12, %15, %cst_12 {dimension_numbers = #tpu.dot_dimension_numbers<[1], [0], [0], [1], [0, 0, 1, 1], [], []>} : vector<16x16xf32>, vector<16x64xf32>, vector<16x64xf32> -> vector<16x64xf32>
    %17 = arith.addf %11, %16 : vector<16x64xf32>
    %18 = vector.extract_strided_slice %6 {offsets = [32, 0], sizes = [16, 16], strides = [1, 1]} : vector<64x16xf32> to vector<16x16xf32>
    %c2 = arith.constant 2 : index
    %c0_13 = arith.constant 0 : index
    %c0_14 = arith.constant 0 : index
    %19 = vector.load %arg4[%c2, %c0_13, %c0_14] : memref<4x16x64xbf16, #tpu.memory_space<vmem>>, vector<1x16x64xbf16>
    %20 = vector.shape_cast %19 : vector<1x16x64xbf16> to vector<16x64xbf16>
    %21 = arith.extf %20 : vector<16x64xbf16> to vector<16x64xf32>
    %cst_15 = arith.constant dense<0.000000e+00> : vector<16x64xf32>
    %22 = tpu.matmul %18, %21, %cst_15 {dimension_numbers = #tpu.dot_dimension_numbers<[1], [0], [0], [1], [0, 0, 1, 1], [], []>} : vector<16x16xf32>, vector<16x64xf32>, vector<16x64xf32> -> vector<16x64xf32>
    %23 = arith.addf %17, %22 : vector<16x64xf32>
    %24 = vector.extract_strided_slice %6 {offsets = [48, 0], sizes = [16, 16], strides = [1, 1]} : vector<64x16xf32> to vector<16x16xf32>
    %c3 = arith.constant 3 : index
    %c0_16 = arith.constant 0 : index
    %c0_17 = arith.constant 0 : index
    %25 = vector.load %arg4[%c3, %c0_16, %c0_17] : memref<4x16x64xbf16, #tpu.memory_space<vmem>>, vector<1x16x64xbf16>
    %26 = vector.shape_cast %25 : vector<1x16x64xbf16> to vector<16x64xbf16>
    %27 = arith.extf %26 : vector<16x64xbf16> to vector<16x64xf32>
    %cst_18 = arith.constant dense<0.000000e+00> : vector<16x64xf32>
    %28 = tpu.matmul %24, %27, %cst_18 {dimension_numbers = #tpu.dot_dimension_numbers<[1], [0], [0], [1], [0, 0, 1, 1], [], []>} : vector<16x16xf32>, vector<16x64xf32>, vector<16x64xf32> -> vector<16x64xf32>
    %29 = arith.addf %23, %28 : vector<16x64xf32>
    %cst_19 = arith.constant 0.000000e+00 : f32
    %30 = vector.broadcast %cst_19 : f32 to vector<16x320xf32>
    %c0_20 = arith.constant 0 : index
    %c0_21 = arith.constant 0 : index
    %31 = vector.load %arg11[%c0_20, %c0_21] : memref<16x320xf32, #tpu.memory_space<vmem>>, vector<16x320xf32>
    tpu.vector_store %arg11[%c0_20, %c0_21], %30 {strides = array<i32>} : memref<16x320xf32, #tpu.memory_space<vmem>>, vector<16x320xf32>,
    %c0_22 = arith.constant 0 : index
    %c128 = arith.constant 128 : index
    %32 = vector.load %arg11[%c0_22, %c128] : memref<16x320xf32, #tpu.memory_space<vmem>>, vector<16x64xf32>
    tpu.vector_store %arg11[%c0_22, %c128], %29 {strides = array<i32>} : memref<16x320xf32, #tpu.memory_space<vmem>>, vector<16x64xf32>,
    %33 = tpu.iota {dimensions = array<i32: 1>} : vector<1x64xi32>
    %c8_i32 = arith.constant 8 : i32
    %c0_i32 = arith.constant 0 : i32
    %34 = arith.cmpi eq, %c8_i32, %c0_i32 : i32
    %c1_i32 = arith.constant 1 : i32
    %35 = arith.select %34, %c1_i32, %c8_i32 : i32
    %36 = vector.broadcast %35 : i32 to vector<1x64xi32>
    %37 = arith.remsi %33, %36 : vector<1x64xi32>
    %c0_i32_23 = arith.constant 0 : i32
    %38 = vector.broadcast %c0_i32_23 : i32 to vector<1x64xi32>
    %39 = arith.cmpi ne, %37, %38 : vector<1x64xi32>
    %c0_i32_24 = arith.constant 0 : i32
    %40 = vector.broadcast %c0_i32_24 : i32 to vector<1x64xi32>
    %41 = arith.cmpi slt, %37, %40 : vector<1x64xi32>
    %c0_i32_25 = arith.constant 0 : i32
    %42 = arith.cmpi slt, %35, %c0_i32_25 : i32
    %43 = vector.broadcast %42 : i1 to vector<1x64xi1>
    %44 = vector.broadcast %43 : vector<1x64xi1> to vector<1x64xi1>
    %45 = arith.xori %41, %44 : vector<1x64xi1>
    %46 = arith.andi %45, %39 : vector<1x64xi1>
    %47 = vector.broadcast %35 : i32 to vector<1x64xi32>
    %48 = arith.addi %37, %47 : vector<1x64xi32>
    %49 = arith.select %46, %48, %37 : vector<1x64xi1>, vector<1x64xi32>
    %c0_26 = arith.constant 0 : index
    %c119 = arith.constant 119 : index
    %50 = vector.load %arg11[%c0_26, %c119] : memref<16x320xf32, #tpu.memory_space<vmem>>, vector<16x64xf32>
    %c0_i32_27 = arith.constant 0 : i32
    %51 = vector.broadcast %c0_i32_27 : i32 to vector<1x64xi32>
    %52 = arith.cmpi ne, %49, %51 : vector<1x64xi32>
    %cst_28 = arith.constant 0.000000e+00 : f32
    %53 = vector.shape_cast %52 : vector<1x64xi1> to vector<1x64xi1>
    %54 = vector.broadcast %53 : vector<1x64xi1> to vector<16x64xi1>
    %55 = vector.broadcast %cst_28 : f32 to vector<16x64xf32>
    %56 = arith.select %54, %50, %55 : vector<16x64xi1>, vector<16x64xf32>
    %c0_29 = arith.constant 0 : index
    %c0_30 = arith.constant 0 : index
    %57 = vector.load %arg12[%c0_29, %c0_30] : memref<144x64xf32, #tpu.memory_space<vmem>>, vector<16x64xf32>
    tpu.vector_store %arg12[%c0_29, %c0_30], %56 {strides = array<i32>} : memref<144x64xf32, #tpu.memory_space<vmem>>, vector<16x64xf32>,
    %c0_31 = arith.constant 0 : index
    %c120 = arith.constant 120 : index
    %58 = vector.load %arg11[%c0_31, %c120] : memref<16x320xf32, #tpu.memory_space<vmem>>, vector<16x64xf32>
    %c16 = arith.constant 16 : index
    %c0_32 = arith.constant 0 : index
    %59 = vector.load %arg12[%c16, %c0_32] : memref<144x64xf32, #tpu.memory_space<vmem>>, vector<16x64xf32>
    tpu.vector_store %arg12[%c16, %c0_32], %58 {strides = array<i32>} : memref<144x64xf32, #tpu.memory_space<vmem>>, vector<16x64xf32>,
    %c0_33 = arith.constant 0 : index
    %c121 = arith.constant 121 : index
    %60 = vector.load %arg11[%c0_33, %c121] : memref<16x320xf32, #tpu.memory_space<vmem>>, vector<16x64xf32>
    %c7_i32 = arith.constant 7 : i32
    %61 = vector.broadcast %c7_i32 : i32 to vector<1x64xi32>
    %62 = arith.cmpi ne, %49, %61 : vector<1x64xi32>
    %cst_34 = arith.constant 0.000000e+00 : f32
    %63 = vector.shape_cast %62 : vector<1x64xi1> to vector<1x64xi1>
    %64 = vector.broadcast %63 : vector<1x64xi1> to vector<16x64xi1>
    %65 = vector.broadcast %cst_34 : f32 to vector<16x64xf32>
    %66 = arith.select %64, %60, %65 : vector<16x64xi1>, vector<16x64xf32>
    %c32 = arith.constant 32 : index
    %c0_35 = arith.constant 0 : index
    %67 = vector.load %arg12[%c32, %c0_35] : memref<144x64xf32, #tpu.memory_space<vmem>>, vector<16x64xf32>
    tpu.vector_store %arg12[%c32, %c0_35], %66 {strides = array<i32>} : memref<144x64xf32, #tpu.memory_space<vmem>>, vector<16x64xf32>,
    %c0_36 = arith.constant 0 : index
    %c127 = arith.constant 127 : index
    %68 = vector.load %arg11[%c0_36, %c127] : memref<16x320xf32, #tpu.memory_space<vmem>>, vector<16x64xf32>
    %c0_i32_37 = arith.constant 0 : i32
    %69 = vector.broadcast %c0_i32_37 : i32 to vector<1x64xi32>
    %70 = arith.cmpi ne, %49, %69 : vector<1x64xi32>
    %cst_38 = arith.constant 0.000000e+00 : f32
    %71 = vector.shape_cast %70 : vector<1x64xi1> to vector<1x64xi1>
    %72 = vector.broadcast %71 : vector<1x64xi1> to vector<16x64xi1>
    %73 = vector.broadcast %cst_38 : f32 to vector<16x64xf32>
    %74 = arith.select %72, %68, %73 : vector<16x64xi1>, vector<16x64xf32>
    %c48 = arith.constant 48 : index
    %c0_39 = arith.constant 0 : index
    %75 = vector.load %arg12[%c48, %c0_39] : memref<144x64xf32, #tpu.memory_space<vmem>>, vector<16x64xf32>
    tpu.vector_store %arg12[%c48, %c0_39], %74 {strides = array<i32>} : memref<144x64xf32, #tpu.memory_space<vmem>>, vector<16x64xf32>,
    %c0_40 = arith.constant 0 : index
    %c128_41 = arith.constant 128 : index
    %76 = vector.load %arg11[%c0_40, %c128_41] : memref<16x320xf32, #tpu.memory_space<vmem>>, vector<16x64xf32>
    %c64 = arith.constant 64 : index
    %c0_42 = arith.constant 0 : index
    %77 = vector.load %arg12[%c64, %c0_42] : memref<144x64xf32, #tpu.memory_space<vmem>>, vector<16x64xf32>
    tpu.vector_store %arg12[%c64, %c0_42], %76 {strides = array<i32>} : memref<144x64xf32, #tpu.memory_space<vmem>>, vector<16x64xf32>,
    %c0_43 = arith.constant 0 : index
    %c129 = arith.constant 129 : index
    %78 = vector.load %arg11[%c0_43, %c129] : memref<16x320xf32, #tpu.memory_space<vmem>>, vector<16x64xf32>
    %c7_i32_44 = arith.constant 7 : i32
    %79 = vector.broadcast %c7_i32_44 : i32 to vector<1x64xi32>
    %80 = arith.cmpi ne, %49, %79 : vector<1x64xi32>
    %cst_45 = arith.constant 0.000000e+00 : f32
    %81 = vector.shape_cast %80 : vector<1x64xi1> to vector<1x64xi1>
    %82 = vector.broadcast %81 : vector<1x64xi1> to vector<16x64xi1>
    %83 = vector.broadcast %cst_45 : f32 to vector<16x64xf32>
    %84 = arith.select %82, %78, %83 : vector<16x64xi1>, vector<16x64xf32>
    %c80 = arith.constant 80 : index
    %c0_46 = arith.constant 0 : index
    %85 = vector.load %arg12[%c80, %c0_46] : memref<144x64xf32, #tpu.memory_space<vmem>>, vector<16x64xf32>
    tpu.vector_store %arg12[%c80, %c0_46], %84 {strides = array<i32>} : memref<144x64xf32, #tpu.memory_space<vmem>>, vector<16x64xf32>,
    %c0_47 = arith.constant 0 : index
    %c135 = arith.constant 135 : index
    %86 = vector.load %arg11[%c0_47, %c135] : memref<16x320xf32, #tpu.memory_space<vmem>>, vector<16x64xf32>
    %c0_i32_48 = arith.constant 0 : i32
    %87 = vector.broadcast %c0_i32_48 : i32 to vector<1x64xi32>
    %88 = arith.cmpi ne, %49, %87 : vector<1x64xi32>
    %cst_49 = arith.constant 0.000000e+00 : f32
    %89 = vector.shape_cast %88 : vector<1x64xi1> to vector<1x64xi1>
    %90 = vector.broadcast %89 : vector<1x64xi1> to vector<16x64xi1>
    %91 = vector.broadcast %cst_49 : f32 to vector<16x64xf32>
    %92 = arith.select %90, %86, %91 : vector<16x64xi1>, vector<16x64xf32>
    %c96 = arith.constant 96 : index
    %c0_50 = arith.constant 0 : index
    %93 = vector.load %arg12[%c96, %c0_50] : memref<144x64xf32, #tpu.memory_space<vmem>>, vector<16x64xf32>
    tpu.vector_store %arg12[%c96, %c0_50], %92 {strides = array<i32>} : memref<144x64xf32, #tpu.memory_space<vmem>>, vector<16x64xf32>,
    %c0_51 = arith.constant 0 : index
    %c136 = arith.constant 136 : index
    %94 = vector.load %arg11[%c0_51, %c136] : memref<16x320xf32, #tpu.memory_space<vmem>>, vector<16x64xf32>
    %c112 = arith.constant 112 : index
    %c0_52 = arith.constant 0 : index
    %95 = vector.load %arg12[%c112, %c0_52] : memref<144x64xf32, #tpu.memory_space<vmem>>, vector<16x64xf32>
    tpu.vector_store %arg12[%c112, %c0_52], %94 {strides = array<i32>} : memref<144x64xf32, #tpu.memory_space<vmem>>, vector<16x64xf32>,
    %c0_53 = arith.constant 0 : index
    %c137 = arith.constant 137 : index
    %96 = vector.load %arg11[%c0_53, %c137] : memref<16x320xf32, #tpu.memory_space<vmem>>, vector<16x64xf32>
    %c7_i32_54 = arith.constant 7 : i32
    %97 = vector.broadcast %c7_i32_54 : i32 to vector<1x64xi32>
    %98 = arith.cmpi ne, %49, %97 : vector<1x64xi32>
    %cst_55 = arith.constant 0.000000e+00 : f32
    %99 = vector.shape_cast %98 : vector<1x64xi1> to vector<1x64xi1>
    %100 = vector.broadcast %99 : vector<1x64xi1> to vector<16x64xi1>
    %101 = vector.broadcast %cst_55 : f32 to vector<16x64xf32>
    %102 = arith.select %100, %96, %101 : vector<16x64xi1>, vector<16x64xf32>
    %c128_56 = arith.constant 128 : index
    %c0_57 = arith.constant 0 : index
    %103 = vector.load %arg12[%c128_56, %c0_57] : memref<144x64xf32, #tpu.memory_space<vmem>>, vector<16x64xf32>
    tpu.vector_store %arg12[%c128_56, %c0_57], %102 {strides = array<i32>} : memref<144x64xf32, #tpu.memory_space<vmem>>, vector<16x64xf32>,
    %c0_58 = arith.constant 0 : index
    %c0_59 = arith.constant 0 : index
    %104 = vector.load %arg5[%c0_58, %c0_59] : memref<32x144xf32, #tpu.memory_space<vmem>>, vector<32x144xf32>
    %c0_60 = arith.constant 0 : index
    %c0_61 = arith.constant 0 : index
    %105 = vector.load %arg12[%c0_60, %c0_61] : memref<144x64xf32, #tpu.memory_space<vmem>>, vector<144x64xf32>
    %cst_62 = arith.constant dense<0.000000e+00> : vector<32x64xf32>
    %106 = tpu.matmul %104, %105, %cst_62 {dimension_numbers = #tpu.dot_dimension_numbers<[1], [0], [0], [1], [0, 0, 1, 1], [], []>} : vector<32x144xf32>, vector<144x64xf32>, vector<32x64xf32> -> vector<32x64xf32>
    %c0_63 = arith.constant 0 : index
    %c0_64 = arith.constant 0 : index
    %107 = vector.load %arg6[%c0_63, %c0_64] : memref<32x1xf32, #tpu.memory_space<vmem>>, vector<32x1xf32>
    %108 = vector.broadcast %107 : vector<32x1xf32> to vector<32x64xf32>
    %109 = arith.addf %106, %108 : vector<32x64xf32>
    %110 = vector.extract_strided_slice %109 {offsets = [0, 0], sizes = [8, 64], strides = [1, 1]} : vector<32x64xf32> to vector<8x64xf32>
    %c0_65 = arith.constant 0 : index
    %c0_66 = arith.constant 0 : index
    %c0_67 = arith.constant 0 : index
    %111 = vector.load %arg7[%c0_65, %c0_66, %c0_67] : memref<4x64x256xbf16, #tpu.memory_space<vmem>>, vector<1x64x256xbf16>
    %112 = vector.shape_cast %111 : vector<1x64x256xbf16> to vector<64x256xbf16>
    %113 = arith.extf %112 : vector<64x256xbf16> to vector<64x256xf32>
    %cst_68 = arith.constant dense<0.000000e+00> : vector<8x256xf32>
    %114 = tpu.matmul %110, %113, %cst_68 {dimension_numbers = #tpu.dot_dimension_numbers<[1], [0], [0], [1], [0, 0, 1, 1], [], []>} : vector<8x64xf32>, vector<64x256xf32>, vector<8x256xf32> -> vector<8x256xf32>
    %115 = vector.extract_strided_slice %109 {offsets = [8, 0], sizes = [8, 64], strides = [1, 1]} : vector<32x64xf32> to vector<8x64xf32>
    %c1_69 = arith.constant 1 : index
    %c0_70 = arith.constant 0 : index
    %c0_71 = arith.constant 0 : index
    %116 = vector.load %arg7[%c1_69, %c0_70, %c0_71] : memref<4x64x256xbf16, #tpu.memory_space<vmem>>, vector<1x64x256xbf16>
    %117 = vector.shape_cast %116 : vector<1x64x256xbf16> to vector<64x256xbf16>
    %118 = arith.extf %117 : vector<64x256xbf16> to vector<64x256xf32>
    %cst_72 = arith.constant dense<0.000000e+00> : vector<8x256xf32>
    %119 = tpu.matmul %115, %118, %cst_72 {dimension_numbers = #tpu.dot_dimension_numbers<[1], [0], [0], [1], [0, 0, 1, 1], [], []>} : vector<8x64xf32>, vector<64x256xf32>, vector<8x256xf32> -> vector<8x256xf32>
    %120 = arith.addf %114, %119 : vector<8x256xf32>
    %121 = vector.extract_strided_slice %109 {offsets = [16, 0], sizes = [8, 64], strides = [1, 1]} : vector<32x64xf32> to vector<8x64xf32>
    %c2_73 = arith.constant 2 : index
    %c0_74 = arith.constant 0 : index
    %c0_75 = arith.constant 0 : index
    %122 = vector.load %arg7[%c2_73, %c0_74, %c0_75] : memref<4x64x256xbf16, #tpu.memory_space<vmem>>, vector<1x64x256xbf16>
    %123 = vector.shape_cast %122 : vector<1x64x256xbf16> to vector<64x256xbf16>
    %124 = arith.extf %123 : vector<64x256xbf16> to vector<64x256xf32>
    %cst_76 = arith.constant dense<0.000000e+00> : vector<8x256xf32>
    %125 = tpu.matmul %121, %124, %cst_76 {dimension_numbers = #tpu.dot_dimension_numbers<[1], [0], [0], [1], [0, 0, 1, 1], [], []>} : vector<8x64xf32>, vector<64x256xf32>, vector<8x256xf32> -> vector<8x256xf32>
    %126 = arith.addf %120, %125 : vector<8x256xf32>
    %127 = vector.extract_strided_slice %109 {offsets = [24, 0], sizes = [8, 64], strides = [1, 1]} : vector<32x64xf32> to vector<8x64xf32>
    %c3_77 = arith.constant 3 : index
    %c0_78 = arith.constant 0 : index
    %c0_79 = arith.constant 0 : index
    %128 = vector.load %arg7[%c3_77, %c0_78, %c0_79] : memref<4x64x256xbf16, #tpu.memory_space<vmem>>, vector<1x64x256xbf16>
    %129 = vector.shape_cast %128 : vector<1x64x256xbf16> to vector<64x256xbf16>
    %130 = arith.extf %129 : vector<64x256xbf16> to vector<64x256xf32>
    %cst_80 = arith.constant dense<0.000000e+00> : vector<8x256xf32>
    %131 = tpu.matmul %127, %130, %cst_80 {dimension_numbers = #tpu.dot_dimension_numbers<[1], [0], [0], [1], [0, 0, 1, 1], [], []>} : vector<8x64xf32>, vector<64x256xf32>, vector<8x256xf32> -> vector<8x256xf32>
    %132 = arith.addf %126, %131 : vector<8x256xf32>
    %cst_81 = arith.constant 0.000000e+00 : f32
    %133 = vector.broadcast %cst_81 : f32 to vector<8x512xf32>
    %c0_82 = arith.constant 0 : index
    %c0_83 = arith.constant 0 : index
    %134 = vector.load %arg13[%c0_82, %c0_83] : memref<8x512xf32, #tpu.memory_space<vmem>>, vector<8x512xf32>
    tpu.vector_store %arg13[%c0_82, %c0_83], %133 {strides = array<i32>} : memref<8x512xf32, #tpu.memory_space<vmem>>, vector<8x512xf32>,
    %c0_84 = arith.constant 0 : index
    %c128_85 = arith.constant 128 : index
    %135 = vector.load %arg13[%c0_84, %c128_85] : memref<8x512xf32, #tpu.memory_space<vmem>>, vector<8x256xf32>
    tpu.vector_store %arg13[%c0_84, %c128_85], %132 {strides = array<i32>} : memref<8x512xf32, #tpu.memory_space<vmem>>, vector<8x256xf32>,
    %136 = tpu.iota {dimensions = array<i32: 1>} : vector<1x256xi32>
    %c16_i32 = arith.constant 16 : i32
    %c0_i32_86 = arith.constant 0 : i32
    %137 = arith.cmpi eq, %c16_i32, %c0_i32_86 : i32
    %c1_i32_87 = arith.constant 1 : i32
    %138 = arith.select %137, %c1_i32_87, %c16_i32 : i32
    %139 = vector.broadcast %138 : i32 to vector<1x256xi32>
    %140 = arith.remsi %136, %139 : vector<1x256xi32>
    %c0_i32_88 = arith.constant 0 : i32
    %141 = vector.broadcast %c0_i32_88 : i32 to vector<1x256xi32>
    %142 = arith.cmpi ne, %140, %141 : vector<1x256xi32>
    %c0_i32_89 = arith.constant 0 : i32
    %143 = vector.broadcast %c0_i32_89 : i32 to vector<1x256xi32>
    %144 = arith.cmpi slt, %140, %143 : vector<1x256xi32>
    %c0_i32_90 = arith.constant 0 : i32
    %145 = arith.cmpi slt, %138, %c0_i32_90 : i32
    %146 = vector.broadcast %145 : i1 to vector<1x256xi1>
    %147 = vector.broadcast %146 : vector<1x256xi1> to vector<1x256xi1>
    %148 = arith.xori %144, %147 : vector<1x256xi1>
    %149 = arith.andi %148, %142 : vector<1x256xi1>
    %150 = vector.broadcast %138 : i32 to vector<1x256xi32>
    %151 = arith.addi %140, %150 : vector<1x256xi32>
    %152 = arith.select %149, %151, %140 : vector<1x256xi1>, vector<1x256xi32>
    %c0_91 = arith.constant 0 : index
    %c111 = arith.constant 111 : index
    %153 = vector.load %arg13[%c0_91, %c111] : memref<8x512xf32, #tpu.memory_space<vmem>>, vector<8x256xf32>
    %c0_i32_92 = arith.constant 0 : i32
    %154 = vector.broadcast %c0_i32_92 : i32 to vector<1x256xi32>
    %155 = arith.cmpi ne, %152, %154 : vector<1x256xi32>
    %cst_93 = arith.constant 0.000000e+00 : f32
    %156 = vector.shape_cast %155 : vector<1x256xi1> to vector<1x256xi1>
    %157 = vector.broadcast %156 : vector<1x256xi1> to vector<8x256xi1>
    %158 = vector.broadcast %cst_93 : f32 to vector<8x256xf32>
    %159 = arith.select %157, %153, %158 : vector<8x256xi1>, vector<8x256xf32>
    %c0_94 = arith.constant 0 : index
    %c0_95 = arith.constant 0 : index
    %160 = vector.load %arg14[%c0_94, %c0_95] : memref<72x256xf32, #tpu.memory_space<vmem>>, vector<8x256xf32>
    tpu.vector_store %arg14[%c0_94, %c0_95], %159 {strides = array<i32>} : memref<72x256xf32, #tpu.memory_space<vmem>>, vector<8x256xf32>,
    %c0_96 = arith.constant 0 : index
    %c112_97 = arith.constant 112 : index
    %161 = vector.load %arg13[%c0_96, %c112_97] : memref<8x512xf32, #tpu.memory_space<vmem>>, vector<8x256xf32>
    %c8 = arith.constant 8 : index
    %c0_98 = arith.constant 0 : index
    %162 = vector.load %arg14[%c8, %c0_98] : memref<72x256xf32, #tpu.memory_space<vmem>>, vector<8x256xf32>
    tpu.vector_store %arg14[%c8, %c0_98], %161 {strides = array<i32>} : memref<72x256xf32, #tpu.memory_space<vmem>>, vector<8x256xf32>,
    %c0_99 = arith.constant 0 : index
    %c113 = arith.constant 113 : index
    %163 = vector.load %arg13[%c0_99, %c113] : memref<8x512xf32, #tpu.memory_space<vmem>>, vector<8x256xf32>
    %c15_i32 = arith.constant 15 : i32
    %164 = vector.broadcast %c15_i32 : i32 to vector<1x256xi32>
    %165 = arith.cmpi ne, %152, %164 : vector<1x256xi32>
    %cst_100 = arith.constant 0.000000e+00 : f32
    %166 = vector.shape_cast %165 : vector<1x256xi1> to vector<1x256xi1>
    %167 = vector.broadcast %166 : vector<1x256xi1> to vector<8x256xi1>
    %168 = vector.broadcast %cst_100 : f32 to vector<8x256xf32>
    %169 = arith.select %167, %163, %168 : vector<8x256xi1>, vector<8x256xf32>
    %c16_101 = arith.constant 16 : index
    %c0_102 = arith.constant 0 : index
    %170 = vector.load %arg14[%c16_101, %c0_102] : memref<72x256xf32, #tpu.memory_space<vmem>>, vector<8x256xf32>
    tpu.vector_store %arg14[%c16_101, %c0_102], %169 {strides = array<i32>} : memref<72x256xf32, #tpu.memory_space<vmem>>, vector<8x256xf32>,
    %c0_103 = arith.constant 0 : index
    %c127_104 = arith.constant 127 : index
    %171 = vector.load %arg13[%c0_103, %c127_104] : memref<8x512xf32, #tpu.memory_space<vmem>>, vector<8x256xf32>
    %c0_i32_105 = arith.constant 0 : i32
    %172 = vector.broadcast %c0_i32_105 : i32 to vector<1x256xi32>
    %173 = arith.cmpi ne, %152, %172 : vector<1x256xi32>
    %cst_106 = arith.constant 0.000000e+00 : f32
    %174 = vector.shape_cast %173 : vector<1x256xi1> to vector<1x256xi1>
    %175 = vector.broadcast %174 : vector<1x256xi1> to vector<8x256xi1>
    %176 = vector.broadcast %cst_106 : f32 to vector<8x256xf32>
    %177 = arith.select %175, %171, %176 : vector<8x256xi1>, vector<8x256xf32>
    %c24 = arith.constant 24 : index
    %c0_107 = arith.constant 0 : index
    %178 = vector.load %arg14[%c24, %c0_107] : memref<72x256xf32, #tpu.memory_space<vmem>>, vector<8x256xf32>
    tpu.vector_store %arg14[%c24, %c0_107], %177 {strides = array<i32>} : memref<72x256xf32, #tpu.memory_space<vmem>>, vector<8x256xf32>,
    %c0_108 = arith.constant 0 : index
    %c128_109 = arith.constant 128 : index
    %179 = vector.load %arg13[%c0_108, %c128_109] : memref<8x512xf32, #tpu.memory_space<vmem>>, vector<8x256xf32>
    %c32_110 = arith.constant 32 : index
    %c0_111 = arith.constant 0 : index
    %180 = vector.load %arg14[%c32_110, %c0_111] : memref<72x256xf32, #tpu.memory_space<vmem>>, vector<8x256xf32>
    tpu.vector_store %arg14[%c32_110, %c0_111], %179 {strides = array<i32>} : memref<72x256xf32, #tpu.memory_space<vmem>>, vector<8x256xf32>,
    %c0_112 = arith.constant 0 : index
    %c129_113 = arith.constant 129 : index
    %181 = vector.load %arg13[%c0_112, %c129_113] : memref<8x512xf32, #tpu.memory_space<vmem>>, vector<8x256xf32>
    %c15_i32_114 = arith.constant 15 : i32
    %182 = vector.broadcast %c15_i32_114 : i32 to vector<1x256xi32>
    %183 = arith.cmpi ne, %152, %182 : vector<1x256xi32>
    %cst_115 = arith.constant 0.000000e+00 : f32
    %184 = vector.shape_cast %183 : vector<1x256xi1> to vector<1x256xi1>
    %185 = vector.broadcast %184 : vector<1x256xi1> to vector<8x256xi1>
    %186 = vector.broadcast %cst_115 : f32 to vector<8x256xf32>
    %187 = arith.select %185, %181, %186 : vector<8x256xi1>, vector<8x256xf32>
    %c40 = arith.constant 40 : index
    %c0_116 = arith.constant 0 : index
    %188 = vector.load %arg14[%c40, %c0_116] : memref<72x256xf32, #tpu.memory_space<vmem>>, vector<8x256xf32>
    tpu.vector_store %arg14[%c40, %c0_116], %187 {strides = array<i32>} : memref<72x256xf32, #tpu.memory_space<vmem>>, vector<8x256xf32>,
    %c0_117 = arith.constant 0 : index
    %c143 = arith.constant 143 : index
    %189 = vector.load %arg13[%c0_117, %c143] : memref<8x512xf32, #tpu.memory_space<vmem>>, vector<8x256xf32>
    %c0_i32_118 = arith.constant 0 : i32
    %190 = vector.broadcast %c0_i32_118 : i32 to vector<1x256xi32>
    %191 = arith.cmpi ne, %152, %190 : vector<1x256xi32>
    %cst_119 = arith.constant 0.000000e+00 : f32
    %192 = vector.shape_cast %191 : vector<1x256xi1> to vector<1x256xi1>
    %193 = vector.broadcast %192 : vector<1x256xi1> to vector<8x256xi1>
    %194 = vector.broadcast %cst_119 : f32 to vector<8x256xf32>
    %195 = arith.select %193, %189, %194 : vector<8x256xi1>, vector<8x256xf32>
    %c48_120 = arith.constant 48 : index
    %c0_121 = arith.constant 0 : index
    %196 = vector.load %arg14[%c48_120, %c0_121] : memref<72x256xf32, #tpu.memory_space<vmem>>, vector<8x256xf32>
    tpu.vector_store %arg14[%c48_120, %c0_121], %195 {strides = array<i32>} : memref<72x256xf32, #tpu.memory_space<vmem>>, vector<8x256xf32>,
    %c0_122 = arith.constant 0 : index
    %c144 = arith.constant 144 : index
    %197 = vector.load %arg13[%c0_122, %c144] : memref<8x512xf32, #tpu.memory_space<vmem>>, vector<8x256xf32>
    %c56 = arith.constant 56 : index
    %c0_123 = arith.constant 0 : index
    %198 = vector.load %arg14[%c56, %c0_123] : memref<72x256xf32, #tpu.memory_space<vmem>>, vector<8x256xf32>
    tpu.vector_store %arg14[%c56, %c0_123], %197 {strides = array<i32>} : memref<72x256xf32, #tpu.memory_space<vmem>>, vector<8x256xf32>,
    %c0_124 = arith.constant 0 : index
    %c145 = arith.constant 145 : index
    %199 = vector.load %arg13[%c0_124, %c145] : memref<8x512xf32, #tpu.memory_space<vmem>>, vector<8x256xf32>
    %c15_i32_125 = arith.constant 15 : i32
    %200 = vector.broadcast %c15_i32_125 : i32 to vector<1x256xi32>
    %201 = arith.cmpi ne, %152, %200 : vector<1x256xi32>
    %cst_126 = arith.constant 0.000000e+00 : f32
    %202 = vector.shape_cast %201 : vector<1x256xi1> to vector<1x256xi1>
    %203 = vector.broadcast %202 : vector<1x256xi1> to vector<8x256xi1>
    %204 = vector.broadcast %cst_126 : f32 to vector<8x256xf32>
    %205 = arith.select %203, %199, %204 : vector<8x256xi1>, vector<8x256xf32>
    %c64_127 = arith.constant 64 : index
    %c0_128 = arith.constant 0 : index
    %206 = vector.load %arg14[%c64_127, %c0_128] : memref<72x256xf32, #tpu.memory_space<vmem>>, vector<8x256xf32>
    tpu.vector_store %arg14[%c64_127, %c0_128], %205 {strides = array<i32>} : memref<72x256xf32, #tpu.memory_space<vmem>>, vector<8x256xf32>,
    %c0_129 = arith.constant 0 : index
    %c0_130 = arith.constant 0 : index
    %207 = vector.load %arg8[%c0_129, %c0_130] : memref<12x72xf32, #tpu.memory_space<vmem>>, vector<12x72xf32>
    %c0_131 = arith.constant 0 : index
    %c0_132 = arith.constant 0 : index
    %208 = vector.load %arg14[%c0_131, %c0_132] : memref<72x256xf32, #tpu.memory_space<vmem>>, vector<72x256xf32>
    %cst_133 = arith.constant dense<0.000000e+00> : vector<12x256xf32>
    %209 = tpu.matmul %207, %208, %cst_133 {dimension_numbers = #tpu.dot_dimension_numbers<[1], [0], [0], [1], [0, 0, 1, 1], [], []>} : vector<12x72xf32>, vector<72x256xf32>, vector<12x256xf32> -> vector<12x256xf32>
    %c0_134 = arith.constant 0 : index
    %c0_135 = arith.constant 0 : index
    %210 = vector.load %arg9[%c0_134, %c0_135] : memref<12x1xf32, #tpu.memory_space<vmem>>, vector<12x1xf32>
    %211 = vector.broadcast %210 : vector<12x1xf32> to vector<12x256xf32>
    %212 = arith.addf %209, %211 : vector<12x256xf32>
    %c0_136 = arith.constant 0 : index
    %c0_137 = arith.constant 0 : index
    %c0_138 = arith.constant 0 : index
    %213 = vector.load %arg10[%c0_136, %c0_137, %c0_138] : memref<1x12x256xf32, #tpu.memory_space<vmem>>, vector<1x12x256xf32>
    %214 = vector.shape_cast %213 : vector<1x12x256xf32> to vector<12x256xf32>
    %215 = vector.shape_cast %212 : vector<12x256xf32> to vector<1x12x256xf32>
    tpu.vector_store %arg10[%c0_136, %c0_137, %c0_138], %215 {strides = array<i32>} : memref<1x12x256xf32, #tpu.memory_space<vmem>>, vector<1x12x256xf32>,
    return
  }
  func.func @transform_0(%arg0: i32) -> (i32, i32, i32) {
    %c0_i32 = arith.constant 0 : i32
    %c0_i32_0 = arith.constant 0 : i32
    %c0_i32_1 = arith.constant 0 : i32
    return %arg0, %c0_i32, %c0_i32_0 : i32, i32, i32
  }
  func.func @transform_1(%arg0: i32) -> (i32, i32) {
    %c0_i32 = arith.constant 0 : i32
    %c0_i32_0 = arith.constant 0 : i32
    %c0_i32_1 = arith.constant 0 : i32
    return %c0_i32, %c0_i32_0 : i32, i32
  }
  func.func @transform_2(%arg0: i32) -> (i32, i32) {
    %c0_i32 = arith.constant 0 : i32
    %c0_i32_0 = arith.constant 0 : i32
    %c0_i32_1 = arith.constant 0 : i32
    return %c0_i32, %c0_i32_0 : i32, i32
  }
  func.func @transform_3(%arg0: i32) -> (i32, i32, i32) {
    %c0_i32 = arith.constant 0 : i32
    %c0_i32_0 = arith.constant 0 : i32
    %c0_i32_1 = arith.constant 0 : i32
    %c0_i32_2 = arith.constant 0 : i32
    return %c0_i32, %c0_i32_0, %c0_i32_1 : i32, i32, i32
  }
  func.func @transform_4(%arg0: i32) -> (i32, i32) {
    %c0_i32 = arith.constant 0 : i32
    %c0_i32_0 = arith.constant 0 : i32
    %c0_i32_1 = arith.constant 0 : i32
    return %c0_i32, %c0_i32_0 : i32, i32
  }
  func.func @transform_5(%arg0: i32) -> (i32, i32) {
    %c0_i32 = arith.constant 0 : i32
    %c0_i32_0 = arith.constant 0 : i32
    %c0_i32_1 = arith.constant 0 : i32
    return %c0_i32, %c0_i32_0 : i32, i32
  }
  func.func @transform_6(%arg0: i32) -> (i32, i32, i32) {
    %c0_i32 = arith.constant 0 : i32
    %c0_i32_0 = arith.constant 0 : i32
    %c0_i32_1 = arith.constant 0 : i32
    %c0_i32_2 = arith.constant 0 : i32
    return %c0_i32, %c0_i32_0, %c0_i32_1 : i32, i32, i32
  }
  func.func @transform_7(%arg0: i32) -> (i32, i32) {
    %c0_i32 = arith.constant 0 : i32
    %c0_i32_0 = arith.constant 0 : i32
    %c0_i32_1 = arith.constant 0 : i32
    return %c0_i32, %c0_i32_0 : i32, i32
  }
  func.func @transform_8(%arg0: i32) -> (i32, i32) {
    %c0_i32 = arith.constant 0 : i32
    %c0_i32_0 = arith.constant 0 : i32
    %c0_i32_1 = arith.constant 0 : i32
    return %c0_i32, %c0_i32_0 : i32, i32
  }
  func.func @transform_9(%arg0: i32) -> (i32, i32, i32) {
    %c0_i32 = arith.constant 0 : i32
    %c0_i32_0 = arith.constant 0 : i32
    %c0_i32_1 = arith.constant 0 : i32
    return %arg0, %c0_i32, %c0_i32_0 : i32, i32, i32
  }
}

</mosaic_0001>

<bundles_post_ra>
// kernel: tile.2
= control target key start
LH: loop header
LB: loop body
LE: loop exit
PB: predicated region body
PF: predicated region fallthrough
CT: control target
= control target key end

     0   :  { %vm7_vm0 = vcmask 7168   ;;  %s26_s10 = smov 126   ;;  %s49_s0 = inlined_call_operand.vmem [shape: f32[4,3], index: 0, kind: input, shape index: {}]   ;;  %s50_s1 = inlined_call_operand.vmem [shape: f32[12,1], index: 1, kind: output, shape index: {}]  }
   0x1   :  { %v4_v0 = vld [vmem:[%s49_s0] sm:$0xf]  ;;  %s25_s0 = smov 127  }
   0x2   :  { %5 = vst [vmem:[#allocation0] sm:$0xf] %v4_v0 }
   0x9   :  { %v9_v1 = vld [vmem:[#allocation0] sm:$0xf]  }
   0xa   :  { %v6_v2 = vld [vmem:[#allocation0] sm:$0xf]   ;;  %10 = vrot.lane.b32.xlu0 %v9_v1, %s25_s0 }
   0xb   :  { %8 = vst.msk [vmem:[%s50_s1] ss:$3 sm:$0xf] %vm7_vm0, %v6_v2   ;;  %v15_v3 = vld [vmem:[#allocation0] sm:$0xf]  }
   0xe   :  { %16 = vrot.lane.b32.xlu0 %v15_v3, %s26_s10 }
  0x7c   :  { %v11_v4 = vpop.permute.xlu0 %10  }
  0x7d   :  { %21 = vst.msk [vmem:[%s50_s1 + $0x1] ss:$3 sm:$0xf] %vm7_vm0, %v11_v4  }
  0x80   :  { %v17_v5 = vpop.permute.xlu0 %16  }
  0x81   :  { %22 = vst.msk [vmem:[%s50_s1 + $0x2] ss:$3 sm:$0xf] %vm7_vm0, %v17_v5  }

// kernel: tile.18
= control target key start
LH: loop header
LB: loop body
LE: loop exit
PB: predicated region body
PF: predicated region fallthrough
CT: control target
= control target key end

     0   :  { %2 = vsyncpa [#allocation1], 0  ;;  %s44_s6 = smov [#allocation0]   ;;  %s70_s0 = inlined_call_operand.hbm [shape: f32[16], index: 0, kind: input, shape index: {}]   ;;  %s71_s1 = inlined_call_operand.vmem [shape: f32[4,16], index: 1, kind: output, shape index: {}]  }
   0x1   :  { %s9_s7 = sshll.u32 %s44_s6, 4  ;;  %s20_s10 = scalar_lea.hbm %s70_s0, 16  ;;  %s10_s7 = int_to_ptr.vmem [resolvable:$true] %s9_s7 }
   0x2   :  { %p21_p0 = scmp.ne.s32.totalorder %s70_s0, %s20_s10  ;;  %p24_p1 = scmp.lt.u32.totalorder %s20_s10, %s70_s0 }
   0x4   :  { %p26_p2 = pnand %p24_p1, %p21_p0 }
   0x6   :  { %29 = shalt.err (!%p26_p2)
}
   0x7   :  { %s30_s15 = scalar_lea.vmem %s10_s7, 16  ;;  %s34_s16 = scalar_lea.vmem %s10_s7, 32 }
   0x8   :  { %p31_p3 = scmp.ne.s32.totalorder %s10_s7, %s30_s15  ;;  %p35_p4 = scmp.lt.s32.totalorder %s10_s7, %s10_s7 }
   0x9   :  { %p36_p5 = scmp.lt.s32.totalorder %s34_s16, %s30_s15 }
   0xb   :  { %p37_p6 = por %p36_p5, %p35_p4 }
   0xd   :  { %p38_p7 = pnand %p37_p6, %p31_p3 }
   0xf   :  { %41 = shalt.err (!%p38_p7)
}
  0x10   :  { %12 = dma.hbm_to_vmem [thread:$0]  %s70_s0, 16, %s10_s7, [#allocation1]  }
  0x11   :  { %42 = dma.done.wait [#allocation1], 16  }
  0x12   :  { %43 = vsyncadd [#allocation1], 4294967280  ;;  %v16_v0 = vld [vmem:[#allocation0] ss:$0 sm:$0xff] }
  0x13   :  { %17 = vst [vmem:[%s71_s1] sm:$0xf] %v16_v0 }
  0x14   :  { %18 = vsyncpa [#allocation1], 1 }

// kernel: tile.23
= control target key start
LH: loop header
LB: loop body
LE: loop exit
PB: predicated region body
PF: predicated region fallthrough
CT: control target
= control target key end

     0   :  { %2 = vsyncpa [#allocation1], 0  ;;  %s44_s6 = smov [#allocation0]   ;;  %s70_s0 = inlined_call_operand.hbm [shape: f32[8], index: 0, kind: input, shape index: {}]   ;;  %s71_s1 = inlined_call_operand.vmem [shape: f32[4,8], index: 1, kind: output, shape index: {}]  }
   0x1   :  { %s9_s7 = sshll.u32 %s44_s6, 4  ;;  %s20_s10 = scalar_lea.hbm %s70_s0, 16  ;;  %s10_s7 = int_to_ptr.vmem [resolvable:$true] %s9_s7 }
   0x2   :  { %p21_p0 = scmp.ne.s32.totalorder %s70_s0, %s20_s10  ;;  %p24_p1 = scmp.lt.u32.totalorder %s20_s10, %s70_s0 }
   0x4   :  { %p26_p2 = pnand %p24_p1, %p21_p0 }
   0x6   :  { %29 = shalt.err (!%p26_p2)
}
   0x7   :  { %s30_s15 = scalar_lea.vmem %s10_s7, 16  ;;  %s34_s16 = scalar_lea.vmem %s10_s7, 32 }
   0x8   :  { %p31_p3 = scmp.ne.s32.totalorder %s10_s7, %s30_s15  ;;  %p35_p4 = scmp.lt.s32.totalorder %s10_s7, %s10_s7 }
   0x9   :  { %p36_p5 = scmp.lt.s32.totalorder %s34_s16, %s30_s15 }
   0xb   :  { %p37_p6 = por %p36_p5, %p35_p4 }
   0xd   :  { %p38_p7 = pnand %p37_p6, %p31_p3 }
   0xf   :  { %41 = shalt.err (!%p38_p7)
}
  0x10   :  { %12 = dma.hbm_to_vmem [thread:$0]  %s70_s0, 16, %s10_s7, [#allocation1]  }
  0x11   :  { %42 = dma.done.wait [#allocation1], 16  }
  0x12   :  { %43 = vsyncadd [#allocation1], 4294967280  ;;  %v16_v0 = vld [vmem:[#allocation0] ss:$0 sm:$0xff] }
  0x13   :  { %17 = vst [vmem:[%s71_s1] sm:$0xf] %v16_v0 }
  0x14   :  { %18 = vsyncpa [#allocation1], 1 }

// kernel: tile.28
= control target key start
LH: loop header
LB: loop body
LE: loop exit
PB: predicated region body
PF: predicated region fallthrough
CT: control target
= control target key end

     0   :  { %2 = vsyncpa [#allocation1], 0  ;;  %s44_s6 = smov [#allocation0]   ;;  %s70_s0 = inlined_call_operand.hbm [shape: f32[3], index: 0, kind: input, shape index: {}]   ;;  %s71_s1 = inlined_call_operand.vmem [shape: f32[4,3], index: 1, kind: output, shape index: {}]  }
   0x1   :  { %s9_s7 = sshll.u32 %s44_s6, 4  ;;  %s20_s10 = scalar_lea.hbm %s70_s0, 16  ;;  %s10_s7 = int_to_ptr.vmem [resolvable:$true] %s9_s7 }
   0x2   :  { %p21_p0 = scmp.ne.s32.totalorder %s70_s0, %s20_s10  ;;  %p24_p1 = scmp.lt.u32.totalorder %s20_s10, %s70_s0 }
   0x4   :  { %p26_p2 = pnand %p24_p1, %p21_p0 }
   0x6   :  { %29 = shalt.err (!%p26_p2)
}
   0x7   :  { %s30_s15 = scalar_lea.vmem %s10_s7, 16  ;;  %s34_s16 = scalar_lea.vmem %s10_s7, 32 }
   0x8   :  { %p31_p3 = scmp.ne.s32.totalorder %s10_s7, %s30_s15  ;;  %p35_p4 = scmp.lt.s32.totalorder %s10_s7, %s10_s7 }
   0x9   :  { %p36_p5 = scmp.lt.s32.totalorder %s34_s16, %s30_s15 }
   0xb   :  { %p37_p6 = por %p36_p5, %p35_p4 }
   0xd   :  { %p38_p7 = pnand %p37_p6, %p31_p3 }
   0xf   :  { %41 = shalt.err (!%p38_p7)
}
  0x10   :  { %12 = dma.hbm_to_vmem [thread:$0]  %s70_s0, 16, %s10_s7, [#allocation1]  }
  0x11   :  { %42 = dma.done.wait [#allocation1], 16  }
  0x12   :  { %43 = vsyncadd [#allocation1], 4294967280  ;;  %v16_v0 = vld [vmem:[#allocation0] ss:$0 sm:$0xff] }
  0x13   :  { %17 = vst [vmem:[%s71_s1] sm:$0xf] %v16_v0 }
  0x14   :  { %18 = vsyncpa [#allocation1], 1 }

// kernel: tile.1
= control target key start
LH: loop header
LB: loop body
LE: loop exit
PB: predicated region body
PF: predicated region fallthrough
CT: control target
= control target key end

     0   :  { %s66_s8 = smov 125   ;;  %vm7_vm0 = vcmask 7168   ;;  %s67_s11 = smov 126   ;;  %s117_s0 = inlined_call_operand.vmem [shape: f32[4,8], index: 0, kind: input, shape index: {}]   ;;  %s118_s1 = inlined_call_operand.vmem [shape: f32[32,1], index: 1, kind: output, shape index: {}]  }
   0x1   :  { %v4_v0 = vld [vmem:[%s117_s0] sm:$0xf]  ;;  %s65_s0 = smov 127   ;;  %s68_s12 = smov 124  }
   0x2   :  { %5 = vst [vmem:[#allocation0] sm:$0xf] %v4_v0  ;;  %s69_s13 = smov 123   ;;  %s70_s14 = smov 122  }
   0x3   :  { %s71_s15 = smov 121  }
   0x9   :  { %v9_v1 = vld [vmem:[#allocation0] sm:$0xf]  }
   0xa   :  { %v21_v2 = vld [vmem:[#allocation0] sm:$0xf]   ;;  %10 = vrot.lane.b32.xlu0 %v9_v1, %s65_s0 }
   0xb   :  { %22 = vrot.lane.b32.xlu1 %v21_v2, %s66_s8  ;;  %v15_v3 = vld [vmem:[#allocation0] sm:$0xf]  }
   0xc   :  { %v27_v4 = vld [vmem:[#allocation0] sm:$0xf]  }
   0xd   :  { %v6_v5 = vld [vmem:[#allocation0] sm:$0xf]  }
   0xe   :  { %8 = vst.msk [vmem:[%s118_s1] ss:$8 sm:$0xf] %vm7_vm0, %v6_v5   ;;  %16 = vrot.lane.b32.xlu0 %v15_v3, %s67_s11  ;;  %v33_v6 = vld [vmem:[#allocation0] sm:$0xf]  }
   0xf   :  { %28 = vrot.lane.b32.xlu1 %v27_v4, %s68_s12  ;;  %v39_v7 = vld [vmem:[#allocation0] sm:$0xf]  }
  0x10   :  { %v45_v8 = vld [vmem:[#allocation0] sm:$0xf]  }
  0x12   :  { %34 = vrot.lane.b32.xlu0 %v33_v6, %s69_s13 }
  0x13   :  { %40 = vrot.lane.b32.xlu1 %v39_v7, %s70_s14 }
  0x16   :  { %46 = vrot.lane.b32.xlu0 %v45_v8, %s71_s15 }
  0x7c   :  { %v11_v9 = vpop.permute.xlu0 %10  }
  0x7d   :  { %v23_v10 = vpop.permute.xlu1 %22   ;;  %51 = vst.msk [vmem:[%s118_s1 + $0x1] ss:$8 sm:$0xf] %vm7_vm0, %v11_v9  }
  0x7e   :  { %53 = vst.msk [vmem:[%s118_s1 + $0x3] ss:$8 sm:$0xf] %vm7_vm0, %v23_v10  }
  0x80   :  { %v17_v11 = vpop.permute.xlu0 %16  }
  0x81   :  { %v29_v12 = vpop.permute.xlu1 %28   ;;  %52 = vst.msk [vmem:[%s118_s1 + $0x2] ss:$8 sm:$0xf] %vm7_vm0, %v17_v11  }
  0x82   :  { %54 = vst.msk [vmem:[%s118_s1 + $0x4] ss:$8 sm:$0xf] %vm7_vm0, %v29_v12  }
  0x84   :  { %v35_v13 = vpop.permute.xlu0 %34  }
  0x85   :  { %v41_v14 = vpop.permute.xlu1 %40   ;;  %55 = vst.msk [vmem:[%s118_s1 + $0x5] ss:$8 sm:$0xf] %vm7_vm0, %v35_v13  }
  0x86   :  { %56 = vst.msk [vmem:[%s118_s1 + $0x6] ss:$8 sm:$0xf] %vm7_vm0, %v41_v14  }
  0x88   :  { %v47_v15 = vpop.permute.xlu0 %46  }
  0x89   :  { %57 = vst.msk [vmem:[%s118_s1 + $0x7] ss:$8 sm:$0xf] %vm7_vm0, %v47_v15  }

// kernel: tile.0
= control target key start
LH: loop header
LB: loop body
LE: loop exit
PB: predicated region body
PF: predicated region fallthrough
CT: control target
= control target key end

     0   :  { %s176_s8 = smov 125   ;;  %s177_s9 = smov 126   ;;  %vm7_vm0 = vcmask 7168   ;;  %s331_s0 = inlined_call_operand.vmem [shape: f32[4,16], index: 0, kind: input, shape index: {}]   ;;  %s332_s1 = inlined_call_operand.vmem [shape: f32[64,1], index: 1, kind: output, shape index: {}]  }
   0x1   :  { %v4_v0 = vld [vmem:[%s331_s0] sm:$0xf]  ;;  %s175_s0 = smov 127   ;;  %s178_s10 = smov 124  }
   0x2   :  { %5 = vst [vmem:[#allocation0] sm:$0xf] %v4_v0  ;;  %s179_s11 = smov 123   ;;  %s180_s12 = smov 122  }
   0x3   :  { %s181_s13 = smov 121   ;;  %s182_s14 = smov 120  }
   0x4   :  { %s183_s19 = smov 119   ;;  %s184_s20 = smov 118  }
   0x5   :  { %s185_s21 = smov 117   ;;  %s186_s22 = smov 116  }
   0x6   :  { %s187_s23 = smov 115   ;;  %s188_s24 = smov 114  }
   0x7   :  { %s189_s25 = smov 113  }
   0x9   :  { %v10_v1 = vld [vmem:[#allocation0] sm:$0xf]  }
   0xa   :  { %v26_v2 = vld [vmem:[#allocation0] sm:$0xf]   ;;  %11 = vrot.lane.b32.xlu0 %v10_v1, %s175_s0 }
   0xb   :  { %27 = vrot.lane.b32.xlu1 %v26_v2, %s176_s8  ;;  %v18_v3 = vld [vmem:[#allocation0] sm:$0xf]  }
   0xc   :  { %v34_v4 = vld [vmem:[#allocation0] sm:$0xf]  }
   0xd   :  { %v42_v5 = vld [vmem:[#allocation0] sm:$0xf]  }
   0xe   :  { %19 = vrot.lane.b32.xlu0 %v18_v3, %s177_s9  ;;  %v50_v6 = vld [vmem:[#allocation0] sm:$0xf]  }
   0xf   :  { %35 = vrot.lane.b32.xlu1 %v34_v4, %s178_s10  ;;  %v58_v7 = vld [vmem:[#allocation0] sm:$0xf]  }
  0x10   :  { %v66_v8 = vld [vmem:[#allocation0] sm:$0xf]  }
  0x11   :  { %v74_v9 = vld [vmem:[#allocation0] sm:$0xf]  }
  0x12   :  { %43 = vrot.lane.b32.xlu0 %v42_v5, %s179_s11  ;;  %v82_v10 = vld [vmem:[#allocation0] sm:$0xf]  }
  0x13   :  { %51 = vrot.lane.b32.xlu1 %v50_v6, %s180_s12  ;;  %v6_v11 = vld [vmem:[#allocation0] sm:$0xf]  }
  0x14   :  { %8 = vst.msk [vmem:[%s332_s1] ss:$16 sm:$0x3] %vm7_vm0, %v6_v11   ;;  %9 = vst.msk [vmem:[%s332_s1] ss:$16 sm:$0xc] %vm7_vm0, %v6_v11  }
  0x15   :  { %v90_v12 = vld [vmem:[#allocation0] sm:$0xf]  }
  0x16   :  { %59 = vrot.lane.b32.xlu0 %v58_v7, %s181_s13  ;;  %v98_v13 = vld [vmem:[#allocation0] sm:$0xf]  }
  0x17   :  { %67 = vrot.lane.b32.xlu1 %v66_v8, %s182_s14  ;;  %v106_v14 = vld [vmem:[#allocation0] sm:$0xf]  }
  0x18   :  { %v114_v15 = vld [vmem:[#allocation0] sm:$0xf]  }
  0x19   :  { %v122_v16 = vld [vmem:[#allocation0] sm:$0xf]  }
  0x1a   :  { %75 = vrot.lane.b32.xlu0 %v74_v9, %s183_s19 }
  0x1b   :  { %83 = vrot.lane.b32.xlu1 %v82_v10, %s184_s20 }
  0x1e   :  { %91 = vrot.lane.b32.xlu0 %v90_v12, %s185_s21 }
  0x1f   :  { %99 = vrot.lane.b32.xlu1 %v98_v13, %s186_s22 }
  0x22   :  { %107 = vrot.lane.b32.xlu0 %v106_v14, %s187_s23 }
  0x23   :  { %115 = vrot.lane.b32.xlu1 %v114_v15, %s188_s24 }
  0x26   :  { %123 = vrot.lane.b32.xlu0 %v122_v16, %s189_s25 }
  0x7c   :  { %v12_v17 = vpop.permute.xlu0 %11  }
  0x7d   :  { %v28_v18 = vpop.permute.xlu1 %27   ;;  %130 = vst.msk [vmem:[%s332_s1 + $0x1] ss:$16 sm:$0x3] %vm7_vm0, %v12_v17   ;;  %131 = vst.msk [vmem:[%s332_s1 + $0x1] ss:$16 sm:$0xc] %vm7_vm0, %v12_v17  }
  0x7e   :  { %134 = vst.msk [vmem:[%s332_s1 + $0x3] ss:$16 sm:$0x3] %vm7_vm0, %v28_v18   ;;  %135 = vst.msk [vmem:[%s332_s1 + $0x3] ss:$16 sm:$0xc] %vm7_vm0, %v28_v18  }
  0x80   :  { %v20_v19 = vpop.permute.xlu0 %19  }
  0x81   :  { %v36_v20 = vpop.permute.xlu1 %35   ;;  %132 = vst.msk [vmem:[%s332_s1 + $0x2] ss:$16 sm:$0x3] %vm7_vm0, %v20_v19   ;;  %133 = vst.msk [vmem:[%s332_s1 + $0x2] ss:$16 sm:$0xc] %vm7_vm0, %v20_v19  }
  0x82   :  { %136 = vst.msk [vmem:[%s332_s1 + $0x4] ss:$16 sm:$0x3] %vm7_vm0, %v36_v20   ;;  %137 = vst.msk [vmem:[%s332_s1 + $0x4] ss:$16 sm:$0xc] %vm7_vm0, %v36_v20  }
  0x84   :  { %v44_v21 = vpop.permute.xlu0 %43  }
  0x85   :  { %v52_v22 = vpop.permute.xlu1 %51   ;;  %138 = vst.msk [vmem:[%s332_s1 + $0x5] ss:$16 sm:$0x3] %vm7_vm0, %v44_v21   ;;  %139 = vst.msk [vmem:[%s332_s1 + $0x5] ss:$16 sm:$0xc] %vm7_vm0, %v44_v21  }
  0x86   :  { %140 = vst.msk [vmem:[%s332_s1 + $0x6] ss:$16 sm:$0x3] %vm7_vm0, %v52_v22   ;;  %141 = vst.msk [vmem:[%s332_s1 + $0x6] ss:$16 sm:$0xc] %vm7_vm0, %v52_v22  }
  0x88   :  { %v60_v23 = vpop.permute.xlu0 %59  }
  0x89   :  { %v68_v24 = vpop.permute.xlu1 %67   ;;  %142 = vst.msk [vmem:[%s332_s1 + $0x7] ss:$16 sm:$0x3] %vm7_vm0, %v60_v23   ;;  %143 = vst.msk [vmem:[%s332_s1 + $0x7] ss:$16 sm:$0xc] %vm7_vm0, %v60_v23  }
  0x8a   :  { %144 = vst.msk [vmem:[%s332_s1 + $0x8] ss:$16 sm:$0x3] %vm7_vm0, %v68_v24   ;;  %145 = vst.msk [vmem:[%s332_s1 + $0x8] ss:$16 sm:$0xc] %vm7_vm0, %v68_v24  }
  0x8c   :  { %v76_v25 = vpop.permute.xlu0 %75  }
  0x8d   :  { %v84_v26 = vpop.permute.xlu1 %83   ;;  %146 = vst.msk [vmem:[%s332_s1 + $0x9] ss:$16 sm:$0x3] %vm7_vm0, %v76_v25   ;;  %147 = vst.msk [vmem:[%s332_s1 + $0x9] ss:$16 sm:$0xc] %vm7_vm0, %v76_v25  }
  0x8e   :  { %148 = vst.msk [vmem:[%s332_s1 + $0xa] ss:$16 sm:$0x3] %vm7_vm0, %v84_v26   ;;  %149 = vst.msk [vmem:[%s332_s1 + $0xa] ss:$16 sm:$0xc] %vm7_vm0, %v84_v26  }
  0x90   :  { %v92_v27 = vpop.permute.xlu0 %91  }
  0x91   :  { %v100_v28 = vpop.permute.xlu1 %99   ;;  %150 = vst.msk [vmem:[%s332_s1 + $0xb] ss:$16 sm:$0x3] %vm7_vm0, %v92_v27   ;;  %151 = vst.msk [vmem:[%s332_s1 + $0xb] ss:$16 sm:$0xc] %vm7_vm0, %v92_v27  }
  0x92   :  { %152 = vst.msk [vmem:[%s332_s1 + $0xc] ss:$16 sm:$0x3] %vm7_vm0, %v100_v28   ;;  %153 = vst.msk [vmem:[%s332_s1 + $0xc] ss:$16 sm:$0xc] %vm7_vm0, %v100_v28  }
  0x94   :  { %v108_v29 = vpop.permute.xlu0 %107  }
  0x95   :  { %v116_v30 = vpop.permute.xlu1 %115   ;;  %154 = vst.msk [vmem:[%s332_s1 + $0xd] ss:$16 sm:$0x3] %vm7_vm0, %v108_v29   ;;  %155 = vst.msk [vmem:[%s332_s1 + $0xd] ss:$16 sm:$0xc] %vm7_vm0, %v108_v29  }
  0x96   :  { %156 = vst.msk [vmem:[%s332_s1 + $0xe] ss:$16 sm:$0x3] %vm7_vm0, %v116_v30   ;;  %157 = vst.msk [vmem:[%s332_s1 + $0xe] ss:$16 sm:$0xc] %vm7_vm0, %v116_v30  }
  0x98   :  { %v124_v31 = vpop.permute.xlu0 %123  }
  0x99   :  { %158 = vst.msk [vmem:[%s332_s1 + $0xf] ss:$16 sm:$0x3] %vm7_vm0, %v124_v31   ;;  %159 = vst.msk [vmem:[%s332_s1 + $0xf] ss:$16 sm:$0xc] %vm7_vm0, %v124_v31  }

// kernel: decoder_forward.1
= control target key start
LH: loop header
LB: loop body
LE: loop exit
PB: predicated region body
PF: predicated region fallthrough
CT: control target
= control target key end

     0   :  { %s2792_s30 = smov 0   ;;  %s3308_s0 = inlined_call_operand.vmem [shape: f32[2,288,16], index: 0, kind: input, shape index: {}]   ;;  %s3309_s1 = inlined_call_operand.vmem [shape: f32[64,288], index: 1, kind: input, shape index: {}]   ;;  %s3310_s2 = inlined_call_operand.vmem [shape: f32[64,1], index: 2, kind: input, shape index: {}]   ;;  %s3311_s3 = inlined_call_operand.vmem [shape: bf16[4,16,64], index: 3, kind: input, shape index: {}]   ;;  %s3312_s4 = inlined_call_operand.vmem [shape: f32[32,144], index: 4, kind: input, shape index: {}]   ;;  %s3313_s5 = inlined_call_operand.vmem [shape: f32[32,1], index: 5, kind: input, shape index: {}]   ;;  %s3314_s6 = inlined_call_operand.vmem [shape: bf16[4,64,256], index: 6, kind: input, shape index: {}]   ;;  %s3315_s7 = inlined_call_operand.vmem [shape: f32[12,72], index: 7, kind: input, shape index: {}]   ;;  %s3316_s8 = inlined_call_operand.vmem [shape: f32[12,1], index: 8, kind: input, shape index: {}]   ;;  %s3317_s9 = inlined_call_operand.vmem [shape: f32[2,12,256], index: 9, kind: output, shape index: {}]  }
   0x1 LB: > { %s2139_s10 = sadd.s32 4294967295, %s2722_s30   ;;  %p2143_p0 = scmp.ge.s32.totalorder %s2722_s30, 1  ;;  %s2722_s30 = sphi %s2792_s30, %s19_s30  }
   0x2   : > { %p287_p1 = scmp.lt.s32.totalorder %s2722_s30, 3 }
   0x4   : > { %p288_p2 = pnand %p2143_p0, %p287_p1 }
   0x5   : > { %p323_p3 = scmp.lt.s32.totalorder (!%p288_p2), %s2139_s10, 1  ;;  %v334_v0 = vld [vmem:[%s3309_s1 + $0x8] sm:$0xff] (!%p288_p2)  ;;  %vm441_vm0 = vcmask (!%p288_p2), 261120   ;;  %v335_v1 = vld [vmem:[%s3309_s1 + $0x10] sm:$0xff] (!%p288_p2)  ;;  %v2724_v2 = vmov (!%p288_p2), 0   ;;  %v393_v39 = vld [vmem:[%s3310_s2] sm:$0xff] (!%p288_p2) }
   0x6   : > { %291 = sbr.rel (%p288_p2) target bundleno = 1536 (0x600), region = 56  ;;  %530 = vmatprep.mubr.f32.mxu0 (!%p288_p2), %v334_v0  ;;  %2611 = vset.pattern.permute.xlu0 (!%p288_p2), %v2724_v2  ;;  %v395_v38 = vld [vmem:[%s3310_s2 + $0x10] sm:$0xff] (!%p288_p2)  ;;  %v396_v44 = vld [vmem:[%s3310_s2 + $0x18] sm:$0xff] (!%p288_p2)  ;;  %v394_v45 = vld [vmem:[%s3310_s2 + $0x8] sm:$0xff] (!%p288_p2)  ;;  %vm685_vm1 = vcmask (!%p288_p2), 130048   ;;  %vm1026_vm2 = vcmask (!%p288_p2), 523264  }
   0x7   : > { %2329 = vmatprep.mubr.msk.f32.mxu1 (!%p288_p2), %vm441_vm0, %v335_v1  ;;  %2612 = vset.pattern.permute.xlu1 (!%p288_p2), %v2724_v2  ;;  %v338_v49 = vld [vmem:[%s3309_s1 + $0x28] sm:$0xff] (!%p288_p2)  ;;  %v341_v51 = vld [vmem:[%s3309_s1 + $0x40] sm:$0xff] (!%p288_p2)  ;;  %v344_v59 = vld [vmem:[%s3309_s1 + $0x58] sm:$0xff] (!%p288_p2)  ;;  %s2726_s11 = smov (!%p288_p2), 9   ;;  %s2727_s12 = smov (!%p288_p2), 7   ;;  %vm1091_vm3 = vcmask (!%p288_p2), 64512  }
   0x8   : > { %413 = vperm.xlu0 (!%p288_p2), %2611, %v395_v38   ;;  %403 = vperm.xlu1 (!%p288_p2), %2612, %v393_v39   ;;  %v397_v52 = vld [vmem:[%s3310_s2 + $0x20] sm:$0xff] (!%p288_p2)  ;;  %v398_v53 = vld [vmem:[%s3310_s2 + $0x28] sm:$0xff] (!%p288_p2)  ;;  %v347_v61 = vld [vmem:[%s3309_s1 + $0x70] sm:$0xff] (!%p288_p2)  ;;  %s2728_s13 = smov (!%p288_p2), 8   ;;  %s2730_s14 = smov (!%p288_p2), 1   ;;  %vm1066_vm4 = vcmask (!%p288_p2), 72704  }
   0x9   : > { %v399_v62 = vld [vmem:[%s3310_s2 + $0x30] sm:$0xff] (!%p288_p2)  ;;  %v400_v63 = vld [vmem:[%s3310_s2 + $0x38] sm:$0xff] (!%p288_p2)  ;;  %s2732_s16 = smov (!%p288_p2), 121   ;;  %s2733_s17 = smov (!%p288_p2), 120   ;;  %vm1117_vm6 = vcmask (!%p288_p2), 56320   ;;  %vm1142_vm8 = vcmask (!%p288_p2), 7168  }
   0xa   : > { %s2734_s19 = smov (!%p288_p2), 119   ;;  %s2735_s28 = smov (!%p288_p2), 17   ;;  %vm1804_vm9 = vcmask (!%p288_p2), 138240   ;;  %vm1849_vm12 = vcmask (!%p288_p2), 121856   ;;  %vm2741_vm13 = vmmov (!%p288_p2), 1  }
   0xb   : > { %s2737_s29 = smov (!%p288_p2), 15  }
   0xc   : > { %418 = vperm.xlu0 (!%p288_p2), %2611, %v396_v44   ;;  %408 = vperm.xlu1 (!%p288_p2), %2612, %v394_v45  }
   0xd   : > { %s3335_s10 = smov (!%p323_p3, %s2139_s10), 1 }
   0xe   : > { %s2584_s15 = smul.u32 288, %s3335_s10  ;;  %s2205_s24 = sshll.u32 %s3335_s10, 5 }
   0xf   : > { %s332_s27 = scalar_lea.vmem %s3317_s9, %s2205_s24 }
  0x10   : > { %s2813_s18 = scalar_lea.vmem %s3308_s0, %s2584_s15  ;;  %423 = vperm.xlu0 %2611, %v397_v52   ;;  %428 = vperm.xlu1 %2612, %v398_v53   ;;  %s2731_s15 = smov 127  }
  0x11   : > { %v373_v3 = vld [vmem:[%s2813_s18 + $0x80] sm:$0xff]  ;;  %v374_v4 = vld [vmem:[%s2813_s18 + $0x88] sm:$0xff]  ;;  %v375_v8 = vld [vmem:[%s2813_s18 + $0x90] sm:$0xff] }
  0x12   : > { %v357_v5 = vld [vmem:[%s2813_s18] sm:$0xff]  ;;  %v2369_v6 = vpack.c.bf16 %v374_v4, %v373_v3  ;;  %v358_v7 = vld [vmem:[%s2813_s18 + $0x8] sm:$0xff]  ;;  %v376_v9 = vld [vmem:[%s2813_s18 + $0x98] sm:$0xff] }
  0x13   : > { %v2371_v10 = vpack.c.bf16 %v358_v7, %v357_v5  ;;  %v2373_v11 = vpack.c.bf16 %v376_v9, %v375_v8  ;;  %v359_v12 = vld [vmem:[%s2813_s18 + $0x10] sm:$0xff]  ;;  %v360_v13 = vld [vmem:[%s2813_s18 + $0x18] sm:$0xff]  ;;  %v377_v14 = vld [vmem:[%s2813_s18 + $0xa0] sm:$0xff] }
  0x14   : > { %2370 = vmatprep.subr.bf16.mxu0 %v2369_v6  ;;  %v378_v15 = vld [vmem:[%s2813_s18 + $0xa8] sm:$0xff]  ;;  %v2375_v16 = vpack.c.bf16 %v360_v13, %v359_v12  ;;  %v361_v18 = vld [vmem:[%s2813_s18 + $0x20] sm:$0xff]  ;;  %v379_v20 = vld [vmem:[%s2813_s18 + $0xb0] sm:$0xff]  ;;  %433 = vperm.xlu0 %2611, %v399_v62  }
  0x15   : > { %2372 = vmatpush3.bf16.msra.mxu0 %v2371_v10  ;;  %v2377_v17 = vpack.c.bf16 %v378_v15, %v377_v14  ;;  %v362_v19 = vld [vmem:[%s2813_s18 + $0x28] sm:$0xff]  ;;  %v380_v21 = vld [vmem:[%s2813_s18 + $0xb8] sm:$0xff]  ;;  %v363_v24 = vld [vmem:[%s2813_s18 + $0x30] sm:$0xff]  ;;  %438 = vperm.xlu1 %2612, %v400_v63  }
  0x16   : > { %2374 = vmatprep.subr.bf16.mxu0 %v2373_v11  ;;  %v2379_v22 = vpack.c.bf16 %v362_v19, %v361_v18  ;;  %v2381_v23 = vpack.c.bf16 %v380_v21, %v379_v20  ;;  %v364_v25 = vld [vmem:[%s2813_s18 + $0x38] sm:$0xff]  ;;  %v381_v26 = vld [vmem:[%s2813_s18 + $0xc0] sm:$0xff]  ;;  %v382_v27 = vld [vmem:[%s2813_s18 + $0xc8] sm:$0xff] }
  0x17   : > { %v389_v28 = vld [vmem:[%s2813_s18 + $0x100] sm:$0xff]  ;;  %v390_v29 = vld [vmem:[%s2813_s18 + $0x108] sm:$0xff]  ;;  %v391_v31 = vld [vmem:[%s2813_s18 + $0x110] sm:$0xff]  ;;  %v2383_v33 = vpack.c.bf16 %v364_v25, %v363_v24  ;;  %v2385_v36 = vpack.c.bf16 %v382_v27, %v381_v26 }
  0x18   : > { %v2401_v30 = vpack.c.bf16 %v390_v29, %v389_v28  ;;  %v392_v32 = vld [vmem:[%s2813_s18 + $0x118] sm:$0xff]  ;;  %v365_v34 = vld [vmem:[%s2813_s18 + $0x40] sm:$0xff]  ;;  %v366_v37 = vld [vmem:[%s2813_s18 + $0x48] sm:$0xff] }
  0x19   : > { %2376 = vmatpush3.bf16.msra.mxu0 %v2375_v16  ;;  %v2405_v35 = vpack.c.bf16 %v392_v32, %v391_v31  ;;  %v383_v40 = vld [vmem:[%s2813_s18 + $0xd0] sm:$0xff]  ;;  %v384_v41 = vld [vmem:[%s2813_s18 + $0xd8] sm:$0xff]  ;;  %v2387_v46 = vpack.c.bf16 %v366_v37, %v365_v34  ;;  %v385_v47 = vld [vmem:[%s2813_s18 + $0xe0] sm:$0xff] }
  0x1a   : > { %2378 = vmatprep.subr.bf16.mxu0 %v2377_v17  ;;  %2402 = vmatprep.subr.bf16.mxu1 %v2401_v30  ;;  %v367_v42 = vld [vmem:[%s2813_s18 + $0x50] sm:$0xff]  ;;  %v368_v43 = vld [vmem:[%s2813_s18 + $0x58] sm:$0xff]  ;;  %v386_v48 = vld [vmem:[%s2813_s18 + $0xe8] sm:$0xff]  ;;  %v2389_v50 = vpack.c.bf16 %v384_v41, %v383_v40 }
  0x1b   : > { %2404 = vmatpush3.bf16.msra.mxu1 %v2401_v30  ;;  %v369_v54 = vld [vmem:[%s2813_s18 + $0x60] sm:$0xff]  ;;  %v370_v55 = vld [vmem:[%s2813_s18 + $0x68] sm:$0xff]  ;;  %v2391_v56 = vpack.c.bf16 %v368_v43, %v367_v42  ;;  %v387_v57 = vld [vmem:[%s2813_s18 + $0xf0] sm:$0xff]  ;;  %v2393_v60 = vpack.c.bf16 %v386_v48, %v385_v47 }
  0x1c   : > { %2406 = vmatprep.subr.bf16.mxu1 %v2405_v35  ;;  %v388_v58 = vld [vmem:[%s2813_s18 + $0xf8] sm:$0xff]  ;;  %v371_v0 = vld [vmem:[%s2813_s18 + $0x70] sm:$0xff]  ;;  %v2395_v2 = vpack.c.bf16 %v370_v55, %v369_v54  ;;  %v350_v4 = vld [vmem:[%s3309_s1 + $0x88] sm:$0xff] }
  0x1d   : > { %2380 = vmatpush3.bf16.msra.mxu0 %v2379_v22  ;;  %v372_v1 = vld [vmem:[%s2813_s18 + $0x78] sm:$0xff]  ;;  %v2397_v3 = vpack.c.bf16 %v388_v58, %v387_v57  ;;  %v353_v5 = vld [vmem:[%s3309_s1 + $0xa0] sm:$0xff]  ;;  %v339_v12 = vld [vmem:[%s3309_s1 + $0x30] sm:$0xff]  ;;  %s2736_s18 = smov 16  }
  0x1e   : > { %2382 = vmatprep.subr.bf16.mxu0 %v2381_v23  ;;  %v2399_v6 = vpack.c.bf16 %v372_v1, %v371_v0  ;;  %v356_v7 = vld [vmem:[%s3309_s1 + $0xb8] sm:$0xff]  ;;  %v333_v8 = vld [vmem:[%s3309_s1] sm:$0xff]  ;;  %v343_v13 = vld [vmem:[%s3309_s1 + $0x50] sm:$0xff] }
  0x1f   : > { %2408 = vmatpush3.bf16.msra.mxu1 %v2405_v35  ;;  %v337_v9 = vld [vmem:[%s3309_s1 + $0x20] sm:$0xff]  ;;  %v336_v10 = vld [vmem:[%s3309_s1 + $0x18] sm:$0xff]  ;;  %v342_v14 = vld [vmem:[%s3309_s1 + $0x48] sm:$0xff] }
  0x20   : > { %v340_v11 = vld [vmem:[%s3309_s1 + $0x38] sm:$0xff]  ;;  %v346_v15 = vld [vmem:[%s3309_s1 + $0x68] sm:$0xff]  ;;  %v345_v16 = vld [vmem:[%s3309_s1 + $0x60] sm:$0xff] }
  0x21   : > { %2384 = vmatpush3.bf16.msra.mxu0 %v2383_v33  ;;  %v349_v17 = vld [vmem:[%s3309_s1 + $0x80] sm:$0xff]  ;;  %v348_v18 = vld [vmem:[%s3309_s1 + $0x78] sm:$0xff]  ;;  %v351_v20 = vld [vmem:[%s3309_s1 + $0x90] sm:$0xff] }
  0x22   : > { %2386 = vmatprep.subr.bf16.mxu0 %v2385_v36  ;;  %2330 = vmatmul.mubr.msk.f32.vlgmr.msra.gmra.mrb[0].mxu1 %vm441_vm0, %v338_v49  ;;  %v352_v19 = vld [vmem:[%s3309_s1 + $0x98] sm:$0xff]  ;;  %v355_v21 = vld [vmem:[%s3309_s1 + $0xb0] sm:$0xff]  ;;  %v354_v22 = vld [vmem:[%s3309_s1 + $0xa8] sm:$0xff] }
  0x23   : > { %2332 = vmatprep.mubr.msk.f32.mxu1 %vm441_vm0, %v341_v51  ;;  %v2222_v23 = vld [vmem:[%s3311_s3 + $0x8] sm:$0xff]   ;;  %v2207_v24 = vld [vmem:[%s3311_s3] sm:$0xff]  }
  0x24   : > { %2410 = vmatprep.subr.bf16.mxu1 %v2222_v23 }
  0x25   : > { %2388 = vmatpush3.bf16.msra.mxu0 %v2387_v46  ;;  %2412 = vmatpush3.bf16.msra.mxu1 %v2222_v23 }
  0x26   : > { %2390 = vmatprep.subr.bf16.mxu0 %v2389_v50  ;;  %2333 = vmatmul.mubr.msk.f32.gmra.mrb[2].mxu1 %vm441_vm0, %v344_v59 }
  0x27   : > { %2335 = vmatprep.mubr.msk.f32.mxu1 %vm441_vm0, %v347_v61  ;;  %2414 = vmatprep.subr.bf16.mxu1 %v2207_v24  ;;  %v2223_v61 = vld [vmem:[%s3311_s3 + $0x10] sm:$0xff]  }
  0x29   : > { %2392 = vmatpush3.bf16.msra.mxu0 %v2391_v56 }
  0x2a   : > { %2394 = vmatprep.subr.bf16.mxu0 %v2393_v60  ;;  %2336 = vmatmul.mubr.msk.f32.gmra.mrb[4].mxu1 %vm441_vm0, %v350_v4 }
  0x2b   : > { %2338 = vmatprep.mubr.msk.f32.mxu1 %vm441_vm0, %v353_v5 }
  0x2d   : > { %2396 = vmatpush3.bf16.msra.mxu0 %v2395_v2 }
  0x2e   : > { %2398 = vmatprep.subr.bf16.mxu0 %v2397_v3  ;;  %2339 = vmatmul.mubr.msk.f32.gmra.mrb[6].mxu1 %vm441_vm0, %v356_v7 }
  0x31   : > { %2400 = vmatpush3.bf16.msra.mxu0 %v2399_v6 }
  0x34   : > { %531 = vmatmul.mubr.f32.vlgmr.msra.gmra.mrb[0].mxu0 %v333_v8 }
  0x35   : > { %535 = vmatprep.mubr.f32.mxu0 %v337_v9 }
  0x38   : > { %536 = vmatmul.mubr.f32.gmra.mrb[2].mxu0 %v336_v10  ;;  %v2224_v10 = vld [vmem:[%s3311_s3 + $0x18] sm:$0xff]  }
  0x39   : > { %540 = vmatprep.mubr.f32.mxu0 %v340_v11 }
  0x3c   : > { %541 = vmatmul.mubr.f32.gmra.mrb[4].mxu0 %v339_v12 }
  0x3d   : > { %545 = vmatprep.mubr.f32.mxu0 %v343_v13 }
  0x40   : > { %546 = vmatmul.mubr.f32.gmra.mrb[6].mxu0 %v342_v14 }
  0x41   : > { %550 = vmatprep.mubr.f32.mxu0 %v346_v15 }
  0x44   : > { %551 = vmatmul.mubr.f32.gmra.mrb[8].mxu0 %v345_v16 }
  0x45   : > { %555 = vmatprep.mubr.f32.mxu0 %v349_v17 }
  0x48   : > { %556 = vmatmul.mubr.f32.gmra.mrb[10].mxu0 %v348_v18 }
  0x49   : > { %560 = vmatprep.mubr.f32.mxu0 %v352_v19  ;;  %v2725_v19 = vmov 0.0  }
  0x4a   : > { %1029 = vst [vmem:[#allocation2 + $0x20] sm:$0xff] %v2725_v19  ;;  %1025 = vst [vmem:[#allocation2 + $0x8] sm:$0xff] %v2725_v19  ;;  %2614 = vrot.lane.b32.xlu0 %v2725_v19, %s2726_s11  ;;  %2619 = vrot.lane.b32.xlu1 %v2725_v19, %s2728_s13 }
  0x4c   : > { %561 = vmatmul.mubr.f32.gmra.mrb[12].mxu0 %v351_v20 }
  0x4d   : > { %565 = vmatprep.mubr.f32.mxu0 %v355_v21 }
  0x4e   : > { %2624 = vrot.lane.b32.xlu0 %v2725_v19, %s2727_s12 }
  0x50   : > { %566 = vmatmul.mubr.f32.gmra.mrb[14].mxu0 %v354_v22 }
  0x87   : > { %v404_v32 = vpop.permute.xlu1 %403  ;;  %v414_v43 = vpop.permute.xlu0 %413 }
  0x8b   : > { %v409_v40 = vpop.permute.xlu1 %408  ;;  %v419_v51 = vpop.permute.xlu0 %418 }
  0x8f   : > { %v424_v60 = vpop.permute.xlu0 %423  ;;  %v429_v3 = vpop.permute.xlu1 %428 }
  0x93   : > { %v434_v9 = vpop.permute.xlu0 %433 }
  0x94   : > { %v439_v16 = vpop.permute.xlu1 %438 }
  0xf5   : > { %v2331_v25 = vpop.f32.mrb[0].mxu1 }
  0xf6   : > { %v637_v26 = vpop.f32.mrb[1].mxu1 }
  0xf9   : > { %v2334_v27 = vpop.f32.mrb[2].mxu1 }
  0xfa   : > { %v647_v28 = vpop.f32.mrb[3].mxu1 }
  0xfd   : > { %v2337_v29 = vpop.f32.mrb[4].mxu1 }
  0xfe   : > { %v657_v30 = vpop.f32.mrb[5].mxu1 }
 0x101   : > { %v2340_v31 = vpop.f32.mrb[6].mxu1 }
 0x102   : > { %v667_v33 = vpop.f32.mrb[7].mxu1 }
 0x107   : > { %v2269_v34 = vpop.f32.mrb[0].mxu0 }
 0x108   : > { %v2270_v35 = vpop.f32.mrb[1].mxu0 }
 0x109   : > { %v2271_v36 = vadd.f32 %v2270_v35, %v2269_v34  ;;  %v2674_v34 = vld [vmem:[%s3314_s6 + $0x64] ss:$8 sps:$4 sm:$0xff]   ;;  %v2676_v35 = vld [vmem:[%s3314_s6 + $0x60] ss:$8 sps:$4 sm:$0xff]  }
 0x10b   : > { %v533_v37 = vadd.f32 %v2271_v36, %v404_v32  ;;  %v2272_v38 = vpop.f32.mrb[2].mxu0  ;;  %v2671_v32 = vld [vmem:[%s3314_s6 + $0x54] ss:$8 sps:$4 sm:$0xff]   ;;  %v1033_v36 = vlaneseq }
 0x10c   : > { %v2273_v39 = vpop.f32.mrb[3].mxu0 }
 0x10d   : > { %v2274_v41 = vadd.f32 %v2273_v39, %v2272_v38  ;;  %v638_v42 = vadd.f32 %v637_v26, %v533_v37  ;;  %v1237_v26 = vld [vmem:[%s3313_s5 + $0x10] sm:$0xff]  ;;  %v2615_v37 = vpop.permute.xlu0 %2614  ;;  %v3019_v38 = vand.u32 127, %v1033_v36 }
 0x10f   : > { %v538_v44 = vadd.f32 %v2274_v41, %v409_v40  ;;  %v2275_v45 = vpop.f32.mrb[4].mxu0  ;;  %v2620_v40 = vpop.permute.xlu1 %2619  ;;  %v1039_v41 = vand.u32 7, %v3019_v38 }
 0x110   : > { %v2276_v46 = vpop.f32.mrb[5].mxu0 }
 0x111   : > { %v643_v47 = vadd.f32 %v2331_v25, %v538_v44  ;;  %v2277_v48 = vadd.f32 %v2276_v46, %v2275_v45  ;;  %v1236_v25 = vld [vmem:[%s3313_s5 + $0x8] sm:$0xff]  ;;  %v2625_v39 = vpop.permute.xlu0 %2624  ;;  %vm3022_vm5 = vcmp.ne.s32.totalorder %v1039_v41, 0  ;;  %vm3038_vm7 = vcmp.ne.s32.totalorder %v1039_v41, 7 }
 0x113   : > { %v2278_v49 = vpop.f32.mrb[6].mxu0  ;;  %v543_v50 = vadd.f32 %v2277_v48, %v414_v43  ;;  %v2622_v43 = vunpack.i.h.bf16 %v2620_v40 }
 0x114   : > { %v2279_v52 = vpop.f32.mrb[7].mxu0 }
 0x115   : > { %v2280_v53 = vadd.f32 %v2279_v52, %v2278_v49  ;;  %v648_v54 = vadd.f32 %v647_v28, %v543_v50  ;;  %v1210_v28 = vld [vmem:[%s3312_s4 + $0x8] sm:$0xff]  ;;  %v2616_v50 = vunpack.i.l.bf16 %v2615_v37 }
 0x116   : > { %2169 = vmatprep.mubr.msk.f32.mxu0 %vm685_vm1, %v1210_v28 }
 0x117   : > { %v548_v55 = vadd.f32 %v2280_v53, %v419_v51  ;;  %v2281_v56 = vpop.f32.mrb[8].mxu0  ;;  %2345 = vmatprep.mubr.msk.f32.mxu1 %vm685_vm1, %v648_v54  ;;  %v2621_v51 = vunpack.i.l.bf16 %v2620_v40 }
 0x118   : > { %v2282_v57 = vpop.f32.mrb[9].mxu0 }
 0x119   : > { %v653_v58 = vadd.f32 %v2334_v27, %v548_v55  ;;  %v2283_v59 = vadd.f32 %v2282_v57, %v2281_v56  ;;  %v1235_v27 = vld [vmem:[%s3313_s5] sm:$0xff]  ;;  %v2627_v57 = vunpack.i.h.bf16 %v2625_v39 }
 0x11b   : > { %v2284_v62 = vpop.f32.mrb[10].mxu0  ;;  %2346 = vmatmul.mubr.msk.f32.vlgmr.msra.gmra.mrb[8].mxu1 %vm685_vm1, %v653_v58  ;;  %v553_v63 = vadd.f32 %v2283_v59, %v424_v60  ;;  %v1213_v58 = vld [vmem:[%s3312_s4 + $0x20] sm:$0xff] }
 0x11c   : > { %v2285_v0 = vpop.f32.mrb[11].mxu0  ;;  %2352 = vmatprep.mubr.msk.f32.mxu1 %vm685_vm1, %v638_v42  ;;  %2416 = vmatpush3.bf16.msra.mxu1 %v2207_v24  ;;  %v2729_v24 = vmov 0.0|0.0   ;;  %v2617_v42 = vunpack.i.h.bf16 %v2615_v37 }
 0x11d   : > { %v2286_v1 = vadd.f32 %v2285_v0, %v2284_v62  ;;  %v658_v2 = vadd.f32 %v657_v30, %v553_v63  ;;  %2418 = vmatprep.subr.bf16.mxu1 %v2223_v61  ;;  %2425 = vmatprep.subr.bf16.mxu0 %v2729_v24  ;;  %v2668_v30 = vld [vmem:[%s3314_s6 + $0x44] ss:$8 sps:$4 sm:$0xff]   ;;  %v2626_v63 = vunpack.i.l.bf16 %v2625_v39 }
 0x11f   : > { %v558_v4 = vadd.f32 %v2286_v1, %v429_v3  ;;  %v2287_v5 = vpop.f32.mrb[12].mxu0 }
 0x120   : > { %v2288_v6 = vpop.f32.mrb[13].mxu0 }
 0x121   : > { %v663_v7 = vadd.f32 %v2337_v29, %v558_v4  ;;  %v2289_v8 = vadd.f32 %v2288_v6, %v2287_v5  ;;  %v1238_v29 = vld [vmem:[%s3313_s5 + $0x18] sm:$0xff] }
 0x123   : > { %v2290_v11 = vpop.f32.mrb[14].mxu0  ;;  %2353 = vmatmul.mubr.msk.f32.vlgmr.msra.gmra.mrb[8].mxu1 %vm685_vm1, %v643_v47  ;;  %v563_v12 = vadd.f32 %v2289_v8, %v434_v9 }
 0x124   : > { %v2291_v13 = vpop.f32.mrb[15].mxu0  ;;  %2359 = vmatprep.mubr.msk.f32.mxu1 %vm685_vm1, %v658_v2  ;;  %2420 = vmatpush3.bf16.msra.mxu1 %v2223_v61 }
 0x125   : > { %v2292_v14 = vadd.f32 %v2291_v13, %v2290_v11  ;;  %v668_v15 = vadd.f32 %v667_v33, %v563_v12  ;;  %2422 = vmatprep.subr.bf16.mxu1 %v2224_v10  ;;  %v2673_v33 = vld [vmem:[%s3314_s6 + $0x50] ss:$8 sps:$4 sm:$0xff]  }
 0x127   : > { %v568_v17 = vadd.f32 %v2292_v14, %v439_v16 }
 0x129   : > { %v673_v18 = vadd.f32 %v2340_v31, %v568_v17  ;;  %v2670_v31 = vld [vmem:[%s3314_s6 + $0x40] ss:$8 sps:$4 sm:$0xff]  }
 0x12b   : > { %2360 = vmatmul.mubr.msk.f32.vlgmr.msra.gmra.mrb[8].mxu1 %vm685_vm1, %v663_v7 }
 0x12c   : > { %2366 = vmatprep.mubr.msk.f32.mxu1 %vm685_vm1, %v668_v15  ;;  %2424 = vmatpush3.bf16.msra.mxu1 %v2224_v10 }
 0x12d   : > { %2453 = vmatprep.subr.bf16.mxu1 %v2668_v30 }
 0x133   : > { %2367 = vmatmul.mubr.msk.f32.vlgmr.msra.gmra.mrb[8].mxu1 %vm685_vm1, %v673_v18 }
 0x134   : > { %1472 = vmatprep.mubr.f32.mxu1 %v2725_v19  ;;  %2455 = vmatpush1.bf16.msra.mxu1 %v2670_v31 }
 0x135   : > { %2457 = vmatprep.subr.bf16.mxu1 %v2671_v32 }
 0x138   : > { %2459 = vmatpush1.bf16.msra.mxu1 %v2673_v33 }
 0x139   : > { %2461 = vmatprep.subr.bf16.mxu1 %v2674_v34 }
 0x13c   : > { %2463 = vmatpush1.bf16.msra.mxu1 %v2676_v35 }
 0x206   : > { %v2368_v20 = vpop.f32.mrb[8].mxu1 }
 0x207   : > { %1032 = vst.msk [vmem:[#allocation2 + $0x20] sm:$0xff] %vm1026_vm2, %v2368_v20  ;;  %v1013_v21 = vpop.f32.mrb[9].mxu1 }
 0x208   : > { %1031 = vst.msk [vmem:[#allocation2 + $0x8] sm:$0xff] %vm1026_vm2, %v1013_v21 }
 0x20e   : > { %v1152_v22 = vld [vmem:[#allocation2 + $0x20] sm:$0xff] }
 0x20f   : > { %1154 = vst.msk [vmem:[#allocation3 + $0x48] sm:$0xff] %vm1026_vm2, %v1152_v22  ;;  %v1151_v23 = vld [vmem:[#allocation2 + $0x8] sm:$0xff]  ;;  %1089 = vrot.lane.b32.xlu1 %v1152_v22, %s2728_s13  ;;  %1064 = vrot.lane.b32.xlu0 %v1152_v22, %s2726_s11 }
 0x210   : > { %1153 = vst.msk [vmem:[#allocation3 + $0x40] sm:$0xff] %vm1026_vm2, %v1151_v23 }
 0x213   : > { %1085 = vrot.lane.b32.xlu0 %v1151_v23, %s2728_s13  ;;  %1060 = vrot.lane.b32.xlu1 %v1151_v23, %s2726_s11 }
 0x216   : > { %v1226_v37 = vld [vmem:[#allocation3 + $0x48] sm:$0xff] }
 0x217   : > { %1115 = vrot.lane.b32.xlu0 %v1152_v22, %s2727_s12  ;;  %2629 = vrot.lane.b32.xlu1 %v2725_v19, %s2730_s14  ;;  %v1225_v36 = vld [vmem:[#allocation3 + $0x40] sm:$0xff] }
 0x218   : > { %v2438_v40 = vpack.c.bf16 %v1226_v37, %v1225_v36  ;;  %v2712_v36 = vld [vmem:[%s3314_s6 + $0xe0] ss:$8 sps:$4 sm:$0xff]   ;;  %v2713_v37 = vld [vmem:[%s3314_s6 + $0xf4] ss:$8 sps:$4 sm:$0xff]  }
 0x21b   : > { %1136 = vrot.lane.b32.xlu0 %v1151_v23, %s2730_s14  ;;  %1111 = vrot.lane.b32.xlu1 %v1151_v23, %s2727_s12 }
 0x21f   : > { %1159 = vrot.lane.b32.xlu0 %v1151_v23, %s2731_s15  ;;  %1140 = vrot.lane.b32.xlu1 %v1152_v22, %s2730_s14 }
 0x223   : > { %1173 = vrot.lane.b32.xlu0 %v1151_v23, %s2732_s16  ;;  %1161 = vrot.lane.b32.xlu1 %v1152_v22, %s2731_s15 }
 0x227   : > { %1187 = vrot.lane.b32.xlu0 %v1151_v23, %s2733_s17  ;;  %1175 = vrot.lane.b32.xlu1 %v1152_v22, %s2732_s16 }
 0x22b   : > { %1199 = vrot.lane.b32.xlu0 %v1151_v23, %s2734_s19  ;;  %1189 = vrot.lane.b32.xlu1 %v1152_v22, %s2733_s17  ;;  %s2738_s17 = smov 113  }
 0x22f   : > { %1246 = vperm.xlu0 %2611, %v1236_v25   ;;  %1201 = vrot.lane.b32.xlu1 %v1152_v22, %s2734_s19  ;;  %s2739_s19 = smov 112  }
 0x233   : > { %1251 = vperm.xlu0 %2611, %v1237_v26   ;;  %1241 = vperm.xlu1 %2612, %v1235_v27  }
 0x237   : > { %1256 = vperm.xlu1 %2612, %v1238_v29   ;;  %1798 = vrot.lane.b32.xlu0 %v2725_v19, %s2735_s28 }
 0x23b   : > { %1819 = vrot.lane.b32.xlu1 %v2725_v19, %s2736_s18  ;;  %1843 = vrot.lane.b32.xlu0 %v2725_v19, %s2737_s29 }
 0x23f   : > { %1864 = vrot.lane.b32.xlu1 %v2725_v19, %s2730_s14 }
 0x281   : > { %v1090_v45 = vpop.permute.xlu1 %1089  ;;  %v1065_v46 = vpop.permute.xlu0 %1064 }
 0x282   : > { %v1093_v47 = vsel %vm1091_vm3, %v2622_v43, %v1090_v45  ;;  %v1068_v48 = vsel %vm1066_vm4, %v2617_v42, %v1065_v46 }
 0x283   : > { %1097 = vst.msk [vmem:[#allocation3 + $0x18] sm:$0xff] %vm1026_vm2, %v1093_v47  ;;  %v1072_v49 = vsel %vm3022_vm5, %v1068_v48, 0.0 }
 0x284   : > { %1074 = vst.msk [vmem:[#allocation3 + $0x8] sm:$0xff] %vm1026_vm2, %v1072_v49 }
 0x285   : > { %v1086_v52 = vpop.permute.xlu0 %1085  ;;  %v1061_v53 = vpop.permute.xlu1 %1060 }
 0x286   : > { %v1092_v54 = vsel %vm1091_vm3, %v2621_v51, %v1086_v52  ;;  %v1067_v55 = vsel %vm1066_vm4, %v2616_v50, %v1061_v53  ;;  %vm1894_vm4 = vcmask 1039360  }
 0x287   : > { %1096 = vst.msk [vmem:[#allocation3 + $0x10] sm:$0xff] %vm1026_vm2, %v1092_v54  ;;  %v1071_v56 = vsel %vm3022_vm5, %v1067_v55, 0.0  ;;  %v1209_v55 = vld [vmem:[%s3312_s4] sm:$0xff] }
 0x288   : > { %1073 = vst.msk [vmem:[#allocation3] sm:$0xff] %vm1026_vm2, %v1071_v56  ;;  %v1212_v56 = vld [vmem:[%s3312_s4 + $0x18] sm:$0xff] }
 0x289   : > { %v1116_v59 = vpop.permute.xlu0 %1115  ;;  %v2630_v60 = vpop.permute.xlu1 %2629 }
 0x28a   : > { %v1119_v61 = vsel %vm1117_vm6, %v2627_v57, %v1116_v59  ;;  %v2631_v0 = vunpack.i.l.bf16 %v2630_v60  ;;  %v2632_v9 = vunpack.i.h.bf16 %v2630_v60  ;;  %v1220_v17 = vld [vmem:[#allocation3 + $0x18] sm:$0xff]  ;;  %v1211_v57 = vld [vmem:[%s3312_s4 + $0x10] sm:$0xff]  ;;  %v1216_v59 = vld [vmem:[%s3312_s4 + $0x38] sm:$0xff] }
 0x28b   : > { %v1123_v62 = vsel %vm3038_vm7, %v1119_v61, 0.0  ;;  %v1218_v8 = vld [vmem:[#allocation3 + $0x8] sm:$0xff]  ;;  %v1215_v60 = vld [vmem:[%s3312_s4 + $0x30] sm:$0xff] }
 0x28c   : > { %1125 = vst.msk [vmem:[#allocation3 + $0x28] sm:$0xff] %vm1026_vm2, %v1123_v62  ;;  %v2677_v61 = vld [vmem:[%s3314_s6 + $0x74] ss:$8 sps:$4 sm:$0xff]   ;;  %v2679_v62 = vld [vmem:[%s3314_s6 + $0x70] ss:$8 sps:$4 sm:$0xff]  }
 0x28d   : > { %v1137_v1 = vpop.permute.xlu0 %1136  ;;  %v1112_v2 = vpop.permute.xlu1 %1111  ;;  %2465 = vmatprep.subr.bf16.mxu1 %v2677_v61 }
 0x28e   : > { %v1143_v3 = vsel %vm1142_vm8, %v2631_v0, %v1137_v1  ;;  %v1118_v4 = vsel %vm1117_vm6, %v2626_v63, %v1112_v2  ;;  %v1219_v13 = vld [vmem:[#allocation3 + $0x10] sm:$0xff]  ;;  %2467 = vmatpush1.bf16.msra.mxu1 %v2679_v62  ;;  %vm1936_vm6 = vcmask 916480  }
 0x28f   : > { %v1147_v5 = vsel %vm3022_vm5, %v1143_v3, 0.0  ;;  %v1122_v6 = vsel %vm3038_vm7, %v1118_v4, 0.0  ;;  %v1217_v7 = vld [vmem:[#allocation3] sm:$0xff]  ;;  %v2429_v18 = vpack.c.bf16 %v1220_v17, %v1219_v13  ;;  %v2680_v63 = vld [vmem:[%s3314_s6 + $0x4] ss:$8 sps:$4 sm:$0xff]  }
 0x290   : > { %1149 = vst.msk [vmem:[#allocation3 + $0x30] sm:$0xff] %vm1026_vm2, %v1147_v5  ;;  %1124 = vst.msk [vmem:[#allocation3 + $0x20] sm:$0xff] %vm1026_vm2, %v1122_v6  ;;  %v2426_v10 = vpack.c.bf16 %v1218_v8, %v1217_v7  ;;  %2469 = vmatprep.subr.bf16.mxu1 %v2680_v63  ;;  %v2682_v4 = vld [vmem:[%s3314_s6] ss:$8 sps:$4 sm:$0xff]   ;;  %v2683_v7 = vld [vmem:[%s3314_s6 + $0x14] ss:$8 sps:$4 sm:$0xff]  }
 0x291   : > { %v1160_v11 = vpop.permute.xlu0 %1159  ;;  %v1141_v12 = vpop.permute.xlu1 %1140  ;;  %v2688_v13 = vld [vmem:[%s3314_s6 + $0x20] ss:$8 sps:$4 sm:$0xff]   ;;  %v2692_v17 = vld [vmem:[%s3314_s6 + $0x84] ss:$8 sps:$4 sm:$0xff]  }
 0x292   : > { %v1165_v14 = vsel %vm3038_vm7, %v1160_v11, 0.0  ;;  %v1144_v15 = vsel %vm1142_vm8, %v2632_v9, %v1141_v12  ;;  %2427 = vmatpush1.bf16.msra.mxu0 %v2426_v10  ;;  %v2685_v9 = vld [vmem:[%s3314_s6 + $0x10] ss:$8 sps:$4 sm:$0xff]   ;;  %v2686_v11 = vld [vmem:[%s3314_s6 + $0x24] ss:$8 sps:$4 sm:$0xff]  }
 0x293   : > { %1167 = vst.msk [vmem:[#allocation3 + $0x50] sm:$0xff] %vm1026_vm2, %v1165_v14  ;;  %v1148_v16 = vsel %vm3022_vm5, %v1144_v15, 0.0  ;;  %2428 = vmatprep.subr.bf16.mxu0 %v2729_v24  ;;  %v1222_v26 = vld [vmem:[#allocation3 + $0x28] sm:$0xff] }
 0x294   : > { %1150 = vst.msk [vmem:[#allocation3 + $0x38] sm:$0xff] %vm1026_vm2, %v1148_v16  ;;  %v2689_v14 = vld [vmem:[%s3314_s6 + $0x34] ss:$8 sps:$4 sm:$0xff]   ;;  %v2691_v16 = vld [vmem:[%s3314_s6 + $0x30] ss:$8 sps:$4 sm:$0xff]  }
 0x295   : > { %v1174_v20 = vpop.permute.xlu0 %1173  ;;  %v1162_v21 = vpop.permute.xlu1 %1161 }
 0x296   : > { %v1179_v22 = vsel %vm3022_vm5, %v1174_v20, 0.0  ;;  %v1166_v23 = vsel %vm3038_vm7, %v1162_v21, 0.0  ;;  %2430 = vmatpush1.bf16.msra.mxu0 %v2429_v18  ;;  %v2694_v20 = vld [vmem:[%s3314_s6 + $0x80] ss:$8 sps:$4 sm:$0xff]  }
 0x297   : > { %1181 = vst.msk [vmem:[#allocation3 + $0x60] sm:$0xff] %vm1026_vm2, %v1179_v22  ;;  %1168 = vst.msk [vmem:[#allocation3 + $0x58] sm:$0xff] %vm1026_vm2, %v1166_v23  ;;  %2431 = vmatprep.subr.bf16.mxu0 %v2729_v24  ;;  %v1221_v25 = vld [vmem:[#allocation3 + $0x20] sm:$0xff]  ;;  %v1223_v31 = vld [vmem:[#allocation3 + $0x30] sm:$0xff] }
 0x298   : > { %v2432_v27 = vpack.c.bf16 %v1222_v26, %v1221_v25  ;;  %v2695_v22 = vld [vmem:[%s3314_s6 + $0x94] ss:$8 sps:$4 sm:$0xff]   ;;  %v2697_v23 = vld [vmem:[%s3314_s6 + $0x90] ss:$8 sps:$4 sm:$0xff]   ;;  %v2698_v25 = vld [vmem:[%s3314_s6 + $0xa4] ss:$8 sps:$4 sm:$0xff]  }
 0x299   : > { %v1188_v28 = vpop.permute.xlu0 %1187  ;;  %v1176_v29 = vpop.permute.xlu1 %1175  ;;  %v2700_v26 = vld [vmem:[%s3314_s6 + $0xa0] ss:$8 sps:$4 sm:$0xff]  }
 0x29a   : > { %1193 = vst.msk [vmem:[#allocation3 + $0x70] sm:$0xff] %vm1026_vm2, %v1188_v28  ;;  %v1180_v30 = vsel %vm3022_vm5, %v1176_v29, 0.0  ;;  %2433 = vmatpush1.bf16.msra.mxu0 %v2432_v27  ;;  %v1227_v44 = vld [vmem:[#allocation3 + $0x50] sm:$0xff]  ;;  %v2701_v27 = vld [vmem:[%s3314_s6 + $0xb4] ss:$8 sps:$4 sm:$0xff]  }
 0x29b   : > { %1182 = vst.msk [vmem:[#allocation3 + $0x68] sm:$0xff] %vm1026_vm2, %v1180_v30  ;;  %2434 = vmatprep.subr.bf16.mxu0 %v2729_v24  ;;  %v1224_v32 = vld [vmem:[#allocation3 + $0x38] sm:$0xff]  ;;  %v2703_v28 = vld [vmem:[%s3314_s6 + $0xb0] ss:$8 sps:$4 sm:$0xff]  }
 0x29c   : > { %v2435_v33 = vpack.c.bf16 %v1224_v32, %v1223_v31  ;;  %v2704_v29 = vld [vmem:[%s3314_s6 + $0xc4] ss:$8 sps:$4 sm:$0xff]   ;;  %v2706_v31 = vld [vmem:[%s3314_s6 + $0xc0] ss:$8 sps:$4 sm:$0xff]  }
 0x29d   : > { %v1200_v34 = vpop.permute.xlu0 %1199  ;;  %v1190_v35 = vpop.permute.xlu1 %1189 }
 0x29e   : > { %v1205_v39 = vsel %vm3038_vm7, %v1200_v34, 0.0  ;;  %1194 = vst.msk [vmem:[#allocation3 + $0x78] sm:$0xff] %vm1026_vm2, %v1190_v35  ;;  %2436 = vmatpush1.bf16.msra.mxu0 %v2435_v33  ;;  %v1228_v42 = vld [vmem:[#allocation3 + $0x58] sm:$0xff]  ;;  %v1229_v47 = vld [vmem:[#allocation3 + $0x60] sm:$0xff] }
 0x29f   : > { %1207 = vst.msk [vmem:[#allocation3 + $0x80] sm:$0xff] %vm1026_vm2, %v1205_v39  ;;  %2437 = vmatprep.subr.bf16.mxu0 %v2729_v24  ;;  %v2441_v45 = vpack.c.bf16 %v1228_v42, %v1227_v44  ;;  %v2707_v33 = vld [vmem:[%s3314_s6 + $0xd4] ss:$8 sps:$4 sm:$0xff]   ;;  %v2709_v34 = vld [vmem:[%s3314_s6 + $0xd0] ss:$8 sps:$4 sm:$0xff]  }
 0x2a0   : > { %v2710_v35 = vld [vmem:[%s3314_s6 + $0xe4] ss:$8 sps:$4 sm:$0xff]   ;;  %v2715_v39 = vld [vmem:[%s3314_s6 + $0xf0] ss:$8 sps:$4 sm:$0xff]  }
 0x2a1   : > { %v1202_v41 = vpop.permute.xlu1 %1201  ;;  %v1231_v50 = vld [vmem:[#allocation3 + $0x70] sm:$0xff] }
 0x2a2   : > { %v1206_v43 = vsel %vm3038_vm7, %v1202_v41, 0.0  ;;  %2439 = vmatpush1.bf16.msra.mxu0 %v2438_v40  ;;  %v1230_v46 = vld [vmem:[#allocation3 + $0x68] sm:$0xff]  ;;  %vm1915_vm7 = vcmask 924672  }
 0x2a3   : > { %1208 = vst.msk [vmem:[#allocation3 + $0x88] sm:$0xff] %vm1026_vm2, %v1206_v43  ;;  %2440 = vmatprep.subr.bf16.mxu0 %v2729_v24  ;;  %v2444_v48 = vpack.c.bf16 %v1230_v46, %v1229_v47  ;;  %v1984_v46 = vld [vmem:[%s3316_s8] sm:$0xff]  ;;  %v1985_v47 = vld [vmem:[%s3316_s8 + $0x8] sm:$0xf] }
 0x2a5   : > { %v1232_v49 = vld [vmem:[#allocation3 + $0x78] sm:$0xff] }
 0x2a6   : > { %2442 = vmatpush1.bf16.msra.mxu0 %v2441_v45  ;;  %v2447_v51 = vpack.c.bf16 %v1232_v49, %v1231_v50  ;;  %v1233_v53 = vld [vmem:[#allocation3 + $0x80] sm:$0xff]  ;;  %v1761_v50 = vadd.s32 128, %v3019_v38 }
 0x2a7   : > { %2443 = vmatprep.subr.bf16.mxu0 %v2729_v24 }
 0x2aa   : > { %2445 = vmatpush1.bf16.msra.mxu0 %v2444_v48  ;;  %v1234_v52 = vld [vmem:[#allocation3 + $0x88] sm:$0xff] }
 0x2ab   : > { %2446 = vmatprep.subr.bf16.mxu0 %v2729_v24  ;;  %v2450_v54 = vpack.c.bf16 %v1234_v52, %v1233_v53  ;;  %v1773_v53 = vand.u32 15, %v1761_v50  ;;  %v1965_v50 = vld [vmem:[%s3315_s7 + $0x8] sm:$0xf] }
 0x2ad   : > { %vm3230_vm10 = vcmp.ne.s32.totalorder %v1773_v53, 0  ;;  %vm3254_vm0 = vcmp.ne.s32.totalorder %v1773_v53, 15 }
 0x2ae   : > { %2448 = vmatpush1.bf16.msra.mxu0 %v2447_v51  ;;  %v1247_v2 = vpop.permute.xlu0 %1246  ;;  %vm3243_vm14 = vmpackc.low %vm2741_vm13, %vm3230_vm10 }
 0x2af   : > { %2449 = vmatprep.subr.bf16.mxu0 %v2729_v24  ;;  %v1214_v24 = vld [vmem:[%s3312_s4 + $0x28] sm:$0xff]  ;;  %vm2529_vm5 = vmpackc.low %vm3254_vm0, %vm2741_vm13 }
 0x2b2   : > { %2451 = vmatpush1.bf16.msra.mxu0 %v2450_v54  ;;  %v1242_v18 = vpop.permute.xlu1 %1241  ;;  %v1252_v30 = vpop.permute.xlu0 %1251  ;;  %v1766_v54 = vand.u32 15, %v3019_v38 }
 0x2b4   : > { %vm3234_vm11 = vcmp.ne.s32.totalorder %v1766_v54, 0 }
 0x2b5   : > { %1336 = vmatmul.mubr.f32.vlgmr.msra.gmra.mrb[16].mxu0 %v1209_v55  ;;  %vm3250_vm15 = vmpackc.low %vm2741_vm13, %vm3234_vm11 }
 0x2b6   : > { %2170 = vmatprep.mubr.msk.f32.mxu0 %vm685_vm1, %v1212_v56  ;;  %v1257_v40 = vpop.permute.xlu1 %1256  ;;  %v1799_v48 = vpop.permute.xlu0 %1798 }
 0x2b9   : > { %1341 = vmatmul.mubr.f32.gmra.mrb[18].mxu0 %v1211_v57 }
 0x2ba   : > { %2171 = vmatprep.mubr.msk.f32.mxu0 %vm685_vm1, %v1214_v24  ;;  %v1820_v49 = vpop.permute.xlu1 %1819  ;;  %v1844_v51 = vpop.permute.xlu0 %1843 }
 0x2bd   : > { %1346 = vmatmul.mubr.f32.gmra.mrb[20].mxu0 %v1213_v58 }
 0x2be   : > { %2172 = vmatprep.mubr.msk.f32.mxu0 %vm685_vm1, %v1216_v59  ;;  %v1865_v52 = vpop.permute.xlu1 %1864 }
 0x2c1   : > { %1351 = vmatmul.mubr.f32.gmra.mrb[22].mxu0 %v1215_v60 }
 0x2c2   : > { %2067 = vmatprep.mubr.f32.mxu0 %v2725_v19 }
 0x388   : > { %v1337_v0 = vpop.f32.mrb[16].mxu0 }
 0x389   : > { %v1339_v1 = vpop.f32.mrb[17].mxu0  ;;  %v1338_v21 = vadd.f32 %v1337_v0, %v1242_v18 }
 0x38c   : > { %v1342_v3 = vpop.f32.mrb[18].mxu0 }
 0x38d   : > { %v1343_v5 = vadd.f32 %v1342_v3, %v1247_v2  ;;  %v1344_v6 = vpop.f32.mrb[19].mxu0 }
 0x38f   : > { %2181 = vmatmul.mubr.msk.f32.vlgmr.msra.gmra.mrb[10].mxu1 %vm1026_vm2, %v1343_v5 }
 0x390   : > { %2471 = vmatpush1.bf16.msra.mxu1 %v2682_v4  ;;  %v1347_v8 = vpop.f32.mrb[20].mxu0  ;;  %1546 = vmatprep.mubr.f32.mxu1 %v2725_v19 }
 0x391   : > { %2473 = vmatprep.subr.bf16.mxu1 %v2683_v7  ;;  %v1349_v10 = vpop.f32.mrb[21].mxu0  ;;  %v1348_v32 = vadd.f32 %v1347_v8, %v1252_v30 }
 0x394   : > { %2475 = vmatpush1.bf16.msra.mxu1 %v2685_v9  ;;  %v1352_v12 = vpop.f32.mrb[22].mxu0 }
 0x395   : > { %2477 = vmatprep.subr.bf16.mxu1 %v2686_v11  ;;  %v1354_v15 = vpop.f32.mrb[23].mxu0  ;;  %v1353_v41 = vadd.f32 %v1352_v12, %v1257_v40 }
 0x398   : > { %2479 = vmatpush1.bf16.msra.mxu1 %v2688_v13 }
 0x399   : > { %2481 = vmatprep.subr.bf16.mxu1 %v2689_v14 }
 0x39c   : > { %2483 = vmatpush1.bf16.msra.mxu1 %v2691_v16 }
 0x39d   : > { %2485 = vmatprep.subr.bf16.mxu1 %v2692_v17 }
 0x39f   : > { %2182 = vmatmul.mubr.msk.f32.vlgmr.msra.gmra.mrb[10].mxu1 %vm1026_vm2, %v1338_v21 }
 0x3a0   : > { %2487 = vmatpush1.bf16.msra.mxu1 %v2694_v20  ;;  %1645 = vmatprep.mubr.f32.mxu1 %v2725_v19 }
 0x3a1   : > { %2489 = vmatprep.subr.bf16.mxu1 %v2695_v22 }
 0x3a4   : > { %2491 = vmatpush1.bf16.msra.mxu1 %v2697_v23 }
 0x3a5   : > { %2493 = vmatprep.subr.bf16.mxu1 %v2698_v25 }
 0x3a8   : > { %2495 = vmatpush1.bf16.msra.mxu1 %v2700_v26 }
 0x3a9   : > { %2497 = vmatprep.subr.bf16.mxu1 %v2701_v27 }
 0x3ac   : > { %2499 = vmatpush1.bf16.msra.mxu1 %v2703_v28 }
 0x3ad   : > { %2501 = vmatprep.subr.bf16.mxu1 %v2704_v29 }
 0x3af   : > { %2191 = vmatmul.mubr.msk.f32.vlgmr.msra.gmra.mrb[10].mxu1 %vm1026_vm2, %v1348_v32 }
 0x3b0   : > { %2503 = vmatpush1.bf16.msra.mxu1 %v2706_v31  ;;  %1746 = vmatprep.mubr.f32.mxu1 %v2725_v19 }
 0x3b1   : > { %2505 = vmatprep.subr.bf16.mxu1 %v2707_v33 }
 0x3b4   : > { %2507 = vmatpush1.bf16.msra.mxu1 %v2709_v34 }
 0x3b5   : > { %2509 = vmatprep.subr.bf16.mxu1 %v2710_v35 }
 0x3b8   : > { %2511 = vmatpush1.bf16.msra.mxu1 %v2712_v36 }
 0x3b9   : > { %2513 = vmatprep.subr.bf16.mxu1 %v2713_v37 }
 0x3bc   : > { %2515 = vmatpush1.bf16.msra.mxu1 %v2715_v39 }
 0x3bf   : > { %2200 = vmatmul.mubr.msk.f32.vlgmr.msra.gmra.mrb[10].mxu1 %vm1026_vm2, %v1353_v41  ;;  %vm2523_vm2 = vmpackc.low %vm3230_vm10, %vm3254_vm0  ;;  %vm1996_vm10 = vcmask 588800  }
 0x492   : > { %v3202_v42 = vpop.f32.mrb[10].mxu1 }
 0x493   : > { %v3204_v43 = vpop.f32.mrb[11].mxu1 }
 0x494   : > { %v2638_v44 = vpack.i.bf16 %v3204_v43, %v3202_v42  ;;  %v2663_v45 = vpack.i.bf16 %v2725_v19, %v3204_v43 }
 0x496   : > { %2639 = vrot.lane.b32.xlu1 %v2638_v44, %s2736_s18  ;;  %2634 = vrot.lane.b32.xlu0 %v2638_v44, %s2735_s28  ;;  %s2740_s28 = smov 111  }
 0x49a   : > { %2649 = vrot.lane.b32.xlu1 %v2638_v44, %s2730_s14  ;;  %2644 = vrot.lane.b32.xlu0 %v2638_v44, %s2737_s29 }
 0x49e   : > { %1888 = vrot.lane.b32.xlu1 %v3202_v42, %s2731_s15  ;;  %1909 = vrot.lane.b32.xlu0 %v3202_v42, %s2738_s17 }
 0x4a2   : > { %2664 = vrot.lane.b32.xlu1 %v2663_v45, %s2739_s19  ;;  %2654 = vrot.lane.b32.xlu0 %v2663_v45, %s2731_s15 }
 0x4a6   : > { %1930 = vrot.lane.b32.xlu1 %v3202_v42, %s2739_s19  ;;  %2659 = vrot.lane.b32.xlu0 %v2663_v45, %s2738_s17 }
 0x4aa   : > { %1953 = vrot.lane.b32.xlu1 %v2725_v19, %s2740_s28  ;;  %1951 = vrot.lane.b32.xlu0 %v3204_v43, %s2740_s28 }
 0x4ae   : > { %1988 = vperm.xlu1 %2612, %v1984_v46   ;;  %1949 = vrot.lane.b32.xlu0 %v3202_v42, %s2740_s28 }
 0x4b2   : > { %1993 = vperm.xlu0 %2611, %v1985_v47  }
 0x508   : > { %v2640_v55 = vpop.permute.xlu1 %2639  ;;  %v2635_v56 = vpop.permute.xlu0 %2634 }
 0x509   : > { %v2642_v58 = vunpack.i.h.bf16 %v2640_v55  ;;  %v2641_v59 = vunpack.i.l.bf16 %v2640_v55  ;;  %v2637_v60 = vunpack.i.h.bf16 %v2635_v56  ;;  %v2636_v61 = vunpack.i.l.bf16 %v2635_v56 }
 0x50b   : > { %v1825_v62 = vsel %vm685_vm1, %v1820_v49, %v2641_v59  ;;  %v1826_v38 = vsel %vm685_vm1, %v2641_v59, %v2642_v58  ;;  %v1805_v63 = vsel %vm1804_vm9, %v1799_v48, %v2636_v61  ;;  %v1806_v0 = vsel %vm1804_vm9, %v2636_v61, %v2637_v60  ;;  %v1964_v49 = vld [vmem:[%s3315_s7] sm:$0xff] }
 0x50c   : > { %v2516_v2 = vpack.c.bf16 %v1826_v38, %v1806_v0  ;;  %v2519_v3 = vpack.c.bf16 %v1825_v62, %v1805_v63  ;;  %v2650_v4 = vpop.permute.xlu1 %2649  ;;  %v2645_v5 = vpop.permute.xlu0 %2644  ;;  %vm3258_vm1 = vcmp.ne.s32.totalorder %v1766_v54, 15  ;;  %vm1955_vm9 = vcmask 908288  }
 0x50d   : > { %v2652_v9 = vunpack.i.h.bf16 %v2650_v4  ;;  %v2651_v10 = vunpack.i.l.bf16 %v2650_v4  ;;  %v2647_v11 = vunpack.i.h.bf16 %v2645_v5  ;;  %v2646_v12 = vunpack.i.l.bf16 %v2645_v5  ;;  %vm2526_vm3 = vmpackc.low %vm3234_vm11, %vm3258_vm1 }
 0x50e   : > { %2518 = vmatprep.subr.msk.bf16.mxu0 %vm3243_vm14, %v2516_v2 }
 0x50f   : > { %v1870_v13 = vsel %vm1142_vm8, %v1865_v52, %v2651_v10  ;;  %v1871_v14 = vsel %vm1142_vm8, %v2651_v10, %v2652_v9  ;;  %v1850_v15 = vsel %vm1849_vm12, %v1844_v51, %v2646_v12  ;;  %v1851_v16 = vsel %vm1849_vm12, %v2646_v12, %v2647_v11  ;;  %2521 = vmatpush1.bf16.msk.msra.mxu0 %vm3250_vm15, %v2519_v3  ;;  %vm2532_vm8 = vmpackc.low %vm3258_vm1, %vm2741_vm13 }
 0x510   : > { %v2522_v17 = vpack.c.bf16 %v1871_v14, %v1851_v16  ;;  %v2525_v18 = vpack.c.bf16 %v1870_v13, %v1850_v15  ;;  %v1889_v20 = vpop.permute.xlu1 %1888  ;;  %v1910_v21 = vpop.permute.xlu0 %1909 }
 0x512   : > { %2524 = vmatprep.subr.msk.bf16.mxu0 %vm2523_vm2, %v2522_v17 }
 0x513   : > { %2527 = vmatpush1.bf16.msk.msra.mxu0 %vm2526_vm3, %v2525_v18 }
 0x514   : > { %v2665_v22 = vpop.permute.xlu1 %2664  ;;  %v2655_v23 = vpop.permute.xlu0 %2654 }
 0x515   : > { %v2657_v25 = vunpack.i.h.bf16 %v2655_v23  ;;  %v2656_v26 = vunpack.i.l.bf16 %v2655_v23  ;;  %v2667_v27 = vunpack.i.h.bf16 %v2665_v22  ;;  %v2666_v28 = vunpack.i.l.bf16 %v2665_v22 }
 0x517   : > { %v1895_v29 = vsel %vm1894_vm4, %v1889_v20, %v2656_v26  ;;  %v1896_v30 = vsel %vm1894_vm4, %v2656_v26, %v2657_v25  ;;  %v1938_v39 = vsel %vm1936_vm6, %v2666_v28, %v2667_v27 }
 0x518   : > { %v2528_v31 = vpack.c.bf16 %v1896_v30, %v3204_v43  ;;  %v2531_v32 = vpack.c.bf16 %v1895_v29, %v3202_v42  ;;  %v1931_v33 = vpop.permute.xlu1 %1930  ;;  %v2660_v34 = vpop.permute.xlu0 %2659 }
 0x519   : > { %v2662_v35 = vunpack.i.h.bf16 %v2660_v34  ;;  %v2661_v36 = vunpack.i.l.bf16 %v2660_v34  ;;  %v1937_v37 = vsel %vm1936_vm6, %v1931_v33, %v2666_v28 }
 0x51a   : > { %2530 = vmatprep.subr.msk.bf16.mxu0 %vm2529_vm5, %v2528_v31 }
 0x51b   : > { %v1916_v40 = vsel %vm1915_vm7, %v1910_v21, %v2661_v36  ;;  %v1917_v41 = vsel %vm1915_vm7, %v2661_v36, %v2662_v35  ;;  %2533 = vmatpush1.bf16.msk.msra.mxu0 %vm2532_vm8, %v2531_v32 }
 0x51c   : > { %v2534_v44 = vpack.c.bf16 %v1938_v39, %v1917_v41  ;;  %v2537_v43 = vpack.c.bf16 %v1937_v37, %v1916_v40  ;;  %v1954_v45 = vpop.permute.xlu1 %1953  ;;  %v1952_v42 = vpop.permute.xlu0 %1951 }
 0x51d   : > { %v1957_v46 = vsel %vm1955_vm9, %v1952_v42, %v1954_v45 }
 0x51e   : > { %2536 = vmatprep.subr.msk.bf16.mxu0 %vm3243_vm14, %v2534_v44 }
 0x51f   : > { %2539 = vmatpush1.bf16.msk.msra.mxu0 %vm3250_vm15, %v2537_v43 }
 0x520   : > { %v1950_v47 = vpop.permute.xlu0 %1949  ;;  %2235 = vmatprep.subr.msk.mxu0 %vm3254_vm0, %v1957_v46 }
 0x521   : > { %v1956_v48 = vsel %vm1955_vm9, %v1950_v47, %v1952_v42 }
 0x523   : > { %2236 = vmatpush1.msk.msra.mxu0 %vm3258_vm1, %v1956_v48 }
 0x524   : > { %2201 = vmatmul.mubr.msk.f32.vlgmr.msra.gmra.mrb[24].mxu0 %vm1996_vm10, %v1964_v49 }
 0x525   : > { %2073 = vmatprep.mubr.f32.mxu0 %v2725_v19 }
 0x528   : > { %2202 = vmatmul.mubr.msk.f32.gmra.mrb[26].mxu0 %vm1996_vm10, %v1965_v50 }
 0x52d   : > { %v1989_v51 = vpop.permute.xlu1 %1988 }
 0x531   : > { %v1994_v56 = vpop.permute.xlu0 %1993 }
 0x5f7   : > { %v2069_v52 = vpop.f32.mrb[24].mxu0 }
 0x5f8   : > { %v2070_v53 = vadd.f32 %v2069_v52, %v1989_v51  ;;  %v2071_v54 = vpop.f32.mrb[25].mxu0 }
 0x5f9   : > { %v2072_v55 = vadd.f32 %v2071_v54, %v1989_v51 }
 0x5fa   : > { %2080 = vst [vmem:[%s332_s27] sm:$0xff] %v2070_v53 }
 0x5fb   : > { %2081 = vst [vmem:[%s332_s27 + $0x8] sm:$0xff] %v2072_v55  ;;  %v2075_v57 = vpop.f32.mrb[26].mxu0 }
 0x5fc   : > { %v2076_v19 = vadd.f32 %v2075_v57, %v1994_v56  ;;  %v2077_v24 = vpop.f32.mrb[27].mxu0 }
 0x5fd   : > { %v2078_v58 = vadd.f32 %v2077_v24, %v1994_v56 }
 0x5fe   : > { %2082 = vst [vmem:[%s332_s27 + $0x10] sm:$0xf] %v2076_v19 }
 0x5ff   : > { %2083 = vst [vmem:[%s332_s27 + $0x18] sm:$0xf] %v2078_v58 }
 0x600 PF: > { %s19_s30 = sadd.s32 1, %s2722_s30  }
 0x601   : > { %p16_p4 = scmp.ge.s32.totalorder %s19_s30, 4  }
 0x603   :  { %18 = sbr.rel (!%p16_p4) target bundleno = 1 (0x1), region = 92 }

</bundles_post_ra>
